<compile_context>
chip_gen: v6e
topology: v6e:2x2x1
jax: 0.10.0
libtpu: 0.0.40
codegen_flags: <defaults>
</compile_context>

<pallas_src>
import math
import numpy as np
import jax
import jax.numpy as jnp
from jax.experimental import pallas as pl
from jax.experimental.pallas import tpu as pltpu


def _vmem_full():
    # Whole-array, single-buffered VMEM residency for constant weights: their
    # block index never changes across the grid, so pipelined double-buffering
    # would be pure VMEM waste (critical on v7x's 64 MiB/TC).
    return pl.BlockSpec(memory_space=pltpu.MemorySpace.VMEM)


# ----------------------------------------------------------------------------
# Pallas kernels
# ----------------------------------------------------------------------------

def enc_head_kernel(featpad_ref, w_pred_ref, b_pred_ref, w_red9_ref, b_red_ref,
                    w_pool_ref, w_lin_ref, b_lin_ref, uh_ref, uwt_ref,
                    msk_ref, big_msk_ref, msk_feat_ref, im2col_ref):
    """Fused encoder head for one batch element (grid axis = batch)."""
    Hp, Wp, C = featpad_ref.shape[1:]
    H, W = Hp - 2, Wp - 2
    S = H * W
    b_pred = b_pred_ref[0, 0]                               # scalar from SMEM

    pad = featpad_ref[0]                                    # (Hp, Wp, C) bf16
    center = pad[1:1 + H, 1:1 + W, :]                       # (H, W, C) bf16

    # ---- preds[0]: 1x1 conv C -> 1 computed once (VPU mul + lane reduce) ----
    prod = center.astype(jnp.float32) * w_pred_ref[...]     # (H, W, C)
    logit2d = jnp.sum(prod, axis=-1) + b_pred               # (H, W)
    logit_col = (jnp.sum(prod.reshape(S, C), axis=-1, keepdims=True)
                 + b_pred)                                  # (S, 1)
    sig_col = jax.nn.sigmoid(logit_col)                     # (S, 1)

    # ---- reduce: 3x3 conv C -> P as ONE long-K MXU matmul -------------------
    # Pack the 9 shifted taps into an (S, 9C) bf16 im2col scratch (lane-aligned
    # stores), then a single (S, 9C) @ (9C, P) dot with f32 accumulation.
    for k in range(9):
        ky, kx = k // 3, k % 3
        im2col_ref[:, k * C:(k + 1) * C] = (
            pad[ky:ky + H, kx:kx + W, :].reshape(S, C))
    red = (jnp.dot(im2col_ref[...], w_red9_ref[...],
                   preferred_element_type=jnp.float32)
           + b_red_ref[...])                                # (S, P) f32

    # msk_feat = reduce(feat) * sigmoid(msk)  (same sigmoid as msk output)
    mf = red * sig_col                                      # (S, P)

    # ---- ParamPool: width-1 conv as VPU mul + lane reduce, softmax over S ---
    pool_logit = jnp.sum(mf * w_pool_ref[...], axis=-1, keepdims=True)  # (S,1)
    m = jnp.max(pool_logit, axis=0, keepdims=True)
    e = jnp.exp(pool_logit - m)
    wsm = e / jnp.sum(e, axis=0, keepdims=True)             # (S, 1)
    pooled = jnp.sum(mf * wsm, axis=0, keepdims=True)       # (1, P)

    # ---- encoder linear P -> E (bf16 MXU, f32 accumulation) -----------------
    msk_feat_ref[0] = (jnp.dot(pooled.astype(jnp.bfloat16), w_lin_ref[...],
                               preferred_element_type=jnp.float32)
                       + b_lin_ref[...])                    # (1, E)

    # ---- fused bilinear x16 upsample of the PRE-sigmoid mask ----------------
    # (PyTorch: big_msk = upsample(pre-sigmoid logits); msk = sigmoid(logits))
    t_up = jnp.dot(uh_ref[...], logit2d.astype(jnp.bfloat16),
                   preferred_element_type=jnp.float32)      # (Ho, W)
    big_msk_ref[0] = jnp.dot(t_up.astype(jnp.bfloat16), uwt_ref[...],
                             preferred_element_type=jnp.float32)  # (Ho, Wo)

    msk_ref[0] = jax.nn.sigmoid(logit2d)                    # (H, W)


def lstm_decode_kernel(seq_ref, wih_ref, whh_ref, b_ref, wout_ref, bout_ref,
                       logits_ref, xproj_scr, h_scr):
    """Single-layer LSTM for one batch element (grid axis = batch), with the
    input projection hoisted ahead of the recurrence and the vocab projection
    batched after it (off the serial critical path)."""
    T1 = seq_ref.shape[1]
    Hg = whh_ref.shape[0]                                   # lane-aligned hidden
    G4 = wih_ref.shape[1]                                   # 4 * Hg

    # Hoisted input projection: one (T1, E) @ (E, 4Hg) MXU matmul + bias.
    x2d = seq_ref[0]                                        # (T1, E) bf16
    xproj_scr[...] = (jnp.dot(x2d, wih_ref[...],
                              preferred_element_type=jnp.float32)
                      + b_ref[...]).reshape(T1, 1, G4)

    def step(t, carry):
        h, c = carry                                        # (1, Hg) f32 each
        gates = xproj_scr[t] + jnp.dot(h.astype(jnp.bfloat16), whh_ref[...],
                                       preferred_element_type=jnp.float32)
        # PyTorch gate order i, f, g, o; each gate is a 128-lane-aligned block
        # (zero padding keeps the padded h/c lanes identically zero).
        i_g = jax.nn.sigmoid(gates[:, 0:Hg])
        f_g = jax.nn.sigmoid(gates[:, Hg:2 * Hg])
        g_g = jnp.tanh(gates[:, 2 * Hg:3 * Hg])
        o_g = jax.nn.sigmoid(gates[:, 3 * Hg:4 * Hg])
        c_new = f_g * c + i_g * g_g
        h_new = o_g * jnp.tanh(c_new)
        h_scr[t] = h_new                                    # stash hidden state
        return (h_new, c_new)

    init = (jnp.zeros((1, Hg), jnp.float32), jnp.zeros((1, Hg), jnp.float32))
    # TODO(synk): switch to a partial unroll (e.g. unroll=4) for long captions.
    jax.lax.fori_loop(0, T1, step, init, unroll=True)

    # Vocab projection hoisted off the recurrence: one (T1, Hg) @ (Hg, Vp)
    # matmul into a lane-dense output slab.
    hall = h_scr[...].reshape(T1, Hg).astype(jnp.bfloat16)
    logits_ref[0] = (jnp.dot(hall, wout_ref[...],
                             preferred_element_type=jnp.float32)
                     + bout_ref[...])                       # (T1, Vp)


# ----------------------------------------------------------------------------
# Pallas call wrappers
# ----------------------------------------------------------------------------

def encoder_head(featpad, w_pred, b_pred, w_red9, b_red, w_pool, w_lin, b_lin,
                 uh, uwt):
    B, Hp, Wp, C = featpad.shape
    H, W = Hp - 2, Wp - 2
    E = w_lin.shape[1]
    Ho, Wo = uh.shape[0], uwt.shape[1]

    return pl.pallas_call(
        enc_head_kernel,
        grid=(B,),
        out_shape=(jax.ShapeDtypeStruct((B, H, W), jnp.float32),
                   jax.ShapeDtypeStruct((B, Ho, Wo), jnp.float32),
                   jax.ShapeDtypeStruct((B, 1, E), jnp.float32)),
        in_specs=[pl.BlockSpec((1, Hp, Wp, C), lambda b: (b, 0, 0, 0)),
                  _vmem_full(),                                        # w_pred
                  pl.BlockSpec(memory_space=pltpu.MemorySpace.SMEM),   # b_pred
                  _vmem_full(), _vmem_full(),                 # w_red9, b_red
                  _vmem_full(), _vmem_full(), _vmem_full(),   # pool, lin, b_lin
                  _vmem_full(), _vmem_full()],                # uh, uwt
        out_specs=(pl.BlockSpec((1, H, W), lambda b: (b, 0, 0)),
                   pl.BlockSpec((1, Ho, Wo), lambda b: (b, 0, 0)),
                   pl.BlockSpec((1, 1, E), lambda b: (b, 0, 0))),
        scratch_shapes=[pltpu.VMEM((H * W, 9 * C), jnp.bfloat16)],
        compiler_params=pltpu.CompilerParams(
            dimension_semantics=("parallel",),
            vmem_limit_bytes=32 * 1024 * 1024),
    )(featpad, w_pred, b_pred, w_red9, b_red, w_pool, w_lin, b_lin, uh, uwt)


def lstm_decode(seq_bte, wih_pad, whh_pad, b_pad, w_out_pad, b_out_pad):
    B, T1, E = seq_bte.shape
    Hg = whh_pad.shape[0]
    Vp = w_out_pad.shape[1]

    return pl.pallas_call(
        lstm_decode_kernel,
        grid=(B,),
        out_shape=jax.ShapeDtypeStruct((B, T1, Vp), jnp.float32),
        in_specs=[pl.BlockSpec((1, T1, E), lambda b: (b, 0, 0)),
                  _vmem_full(), _vmem_full(), _vmem_full(),
                  _vmem_full(), _vmem_full()],
        out_specs=pl.BlockSpec((1, T1, Vp), lambda b: (b, 0, 0)),
        scratch_shapes=[pltpu.VMEM((T1, 1, 4 * Hg), jnp.float32),
                        pltpu.VMEM((T1, 1, Hg), jnp.float32)],
        compiler_params=pltpu.CompilerParams(
            dimension_semantics=("parallel",),
            vmem_limit_bytes=32 * 1024 * 1024),
    )(seq_bte, wih_pad, whh_pad, b_pad, w_out_pad, b_out_pad)


# ----------------------------------------------------------------------------
# Glue / parameter setup
# ----------------------------------------------------------------------------

def bilinear_matrix(n_in, n_out):
    """F.upsample_bilinear == interpolate(mode='bilinear', align_corners=True)."""
    U = np.zeros((n_out, n_in), dtype=np.float32)
    for o in range(n_out):
        src = 0.0 if n_out == 1 else o * (n_in - 1) / (n_out - 1)
        i0 = int(np.floor(src))
        i1 = min(i0 + 1, n_in - 1)
        f = src - i0
        U[o, i0] += 1.0 - f
        U[o, i1] += f
    return U


def _pad_gate_cols(w, hd, hg):
    """Zero-pad each of the 4 LSTM gate blocks from hd to hg (lane-aligned)."""
    parts = []
    for g in range(4):
        blk = w[..., g * hd:(g + 1) * hd]
        parts.append(jnp.pad(blk, [(0, 0)] * (w.ndim - 1) + [(0, hg - hd)]))
    return jnp.concatenate(parts, axis=-1)


def enc_dec_forward(images, captions, lengths, params):
    B = images.shape[0]
    C = params['w_stub'].shape[1]
    H = images.shape[2] // 16
    W = images.shape[3] // 16
    P = params['w_red'].shape[-1]

    # --- backbone stand-in (see TODO(synk) above): stride-16 patch projection -
    x = images.reshape(B, 3, H, 16, W, 16)
    x = jnp.transpose(x, (0, 2, 4, 1, 3, 5)).reshape(B, H, W, 3 * 16 * 16)
    feat_nhwc = jnp.dot(x, params['w_stub'])                 # (B, H, W, C) f32

    # zero-pad once for the in-kernel 3x3 conv (bf16 -> half the HBM traffic)
    featpad = jnp.pad(feat_nhwc.astype(jnp.bfloat16),
                      ((0, 0), (1, 1), (1, 1), (0, 0)))

    msk, big_msk, msk_feat = encoder_head(
        featpad,
        params['w_pred'].reshape(1, 1, C),                   # (1, 1, C) f32
        params['b_pred'],                                    # (1, 1) -> SMEM
        params['w_red'].reshape(9 * C, P).astype(jnp.bfloat16),  # (9C, P)
        params['b_red'],
        params['w_pool'].reshape(1, P),                      # (1, P) f32
        params['w_lin'].astype(jnp.bfloat16), params['b_lin'],
        params['uh'].astype(jnp.bfloat16),
        params['uwt'].astype(jnp.bfloat16))
    # msk: (B, H, W); big_msk: (B, 16H, 16W); msk_feat: (B, 1, E)

    # --- decoder: embed captions, prepend feature, fused LSTM + vocab linear --
    emb = jnp.take(params['embed_w'], captions, axis=0)      # (B, T, E)
    seq = jnp.concatenate([msk_feat, emb], axis=1)           # (B, T+1, E)
    seq_b = seq.astype(jnp.bfloat16)

    Hd = params['whh_t'].shape[0]
    Hg = ((Hd + 127) // 128) * 128                           # lane-aligned gates
    V = params['w_out'].shape[1]
    Vp = ((V + 127) // 128) * 128                            # lane-dense vocab

    wih_pad = _pad_gate_cols(params['wih_t'], Hd, Hg).astype(jnp.bfloat16)
    whh_pad = _pad_gate_cols(
        jnp.pad(params['whh_t'], ((0, Hg - Hd), (0, 0))), Hd, Hg
    ).astype(jnp.bfloat16)
    b_pad = _pad_gate_cols(params['b_lstm'], Hd, Hg)
    w_out_pad = jnp.pad(params['w_out'],
                        ((0, Hg - Hd), (0, Vp - V))).astype(jnp.bfloat16)
    b_out_pad = jnp.pad(params['b_out'], ((0, 0), (0, Vp - V)))

    logits = lstm_decode(seq_b, wih_pad, whh_pad, b_pad,
                         w_out_pad, b_out_pad)               # (B, T+1, Vp)

    # pack_padded_sequence(batch_first=True) data ordering (host-side lengths,
    # assumed sorted descending with max <= T+1, enforce_sorted=True).
    t_idx, b_idx = [], []
    for t in range(seq.shape[1]):
        for b in range(B):
            if lengths[b] > t:
                t_idx.append(t)
                b_idx.append(b)
    outputs = logits[jnp.array(b_idx), jnp.array(t_idx)][:, :V]  # (sum(len), V)

    # PyTorch-shaped (NCHW) outputs: (big_msk, msk, outputs)
    return (big_msk.reshape(B, 1, 16 * H, 16 * W),
            msk.reshape(B, 1, H, W),
            outputs)


if __name__ == "__main__":
    # small shapes consistent with the module
    B, Himg, Wimg = 2, 128, 128          # images: (B, 3, 128, 128) -> feature 8x8
    C_feat = 128                          # backbone-stub channels (for 1664)
    P = 128                               # patt_size (for 512)
    E = 32                                # embed_size
    Hd = 64                               # hidden_size
    V = 24                                # vocab_size
    T_cap = 6                             # caption length
    lengths = [7, 5]                      # packed lengths (<= T_cap + 1, sorted)

    key = jax.random.PRNGKey(0)
    ks = jax.random.split(key, 12)

    images = jax.random.normal(ks[0], (B, 3, Himg, Wimg), jnp.float32)
    captions = jax.random.randint(ks[1], (B, T_cap), 0, V, dtype=jnp.int32)

    k_lstm = 1.0 / math.sqrt(Hd)
    params = {
        # backbone stub
        'w_stub': jax.random.normal(ks[2], (3 * 16 * 16, C_feat), jnp.float32) * 0.05,
        # encoder head params (PyTorch init: normal(0, 0.02), zero bias)
        'w_pred': jax.random.normal(ks[3], (C_feat, 1), jnp.float32) * 0.02,
        'b_pred': jnp.zeros((1, 1), jnp.float32),
        # NOTE: a real Conv2d checkpoint stores (P, C, 3, 3); permute (2, 3, 1, 0)
        # before the (9C, P) reshape so the tap/channel contraction order matches.
        'w_red': jax.random.normal(ks[4], (3, 3, C_feat, P), jnp.float32) * 0.02,
        'b_red': jnp.zeros((1, P), jnp.float32),
        'w_pool': jax.random.normal(ks[5], (P, 1), jnp.float32) * 0.02,
        'w_lin': jax.random.normal(ks[6], (P, E), jnp.float32) * 0.02,
        'b_lin': jnp.zeros((1, E), jnp.float32),
        # bilinear x16 upsample matrices (align_corners=True)
        'uh': jnp.asarray(bilinear_matrix(Himg // 16, Himg)),
        'uwt': jnp.asarray(bilinear_matrix(Wimg // 16, Wimg).T),
        # decoder params (default-style init, deterministic)
        'embed_w': jax.random.normal(ks[7], (V, E), jnp.float32),
        # NOTE: b_lstm stands in for PyTorch's bias_ih + bias_hh (sum when loading).
        'wih_t': jax.random.uniform(ks[8], (E, 4 * Hd), jnp.float32, -k_lstm, k_lstm),
        'whh_t': jax.random.uniform(ks[9], (Hd, 4 * Hd), jnp.float32, -k_lstm, k_lstm),
        'b_lstm': jax.random.uniform(ks[10], (1, 4 * Hd), jnp.float32,
                                     -2 * k_lstm, 2 * k_lstm),
        'w_out': jax.random.normal(ks[11], (Hd, V), jnp.float32) * 0.02,
        'b_out': jnp.zeros((1, V), jnp.float32),
    }

    big_msk, msk, outputs = enc_dec_forward(images, captions, lengths, params)
    jax.block_until_ready((big_msk, msk, outputs))
    assert big_msk.shape == (B, 1, Himg, Wimg)
    assert msk.shape == (B, 1, Himg // 16, Wimg // 16)
    assert outputs.shape == (sum(lengths), V)
    print("KERNEL_OK")
</pallas_src>

<mosaic_0001>
module attributes {stable_mosaic.version = 11 : i64} {
  func.func @enc_head_kernel(%arg0: i32, %arg1: memref<1x10x10x128xbf16, #tpu.memory_space<vmem>>, %arg2: memref<1x1x128xf32, #tpu.memory_space<vmem>>, %arg3: memref<1x1xf32, #tpu.memory_space<smem>>, %arg4: memref<1152x128xbf16, #tpu.memory_space<vmem>>, %arg5: memref<1x128xf32, #tpu.memory_space<vmem>>, %arg6: memref<1x128xf32, #tpu.memory_space<vmem>>, %arg7: memref<128x32xbf16, #tpu.memory_space<vmem>>, %arg8: memref<1x32xf32, #tpu.memory_space<vmem>>, %arg9: memref<128x8xbf16, #tpu.memory_space<vmem>>, %arg10: memref<8x128xbf16, #tpu.memory_space<vmem>>, %arg11: memref<1x8x8xf32, #tpu.memory_space<vmem>>, %arg12: memref<1x128x128xf32, #tpu.memory_space<vmem>>, %arg13: memref<1x1x32xf32, #tpu.memory_space<vmem>>, %arg14: memref<64x1152xbf16, #tpu.memory_space<vmem>>) attributes {dimension_semantics = [#tpu.dimension_semantics<parallel>], iteration_bounds = array<i64: 2>, scalar_prefetch = 0 : i64, scratch_operands = 1 : i64, tpu.core_type = #tpu.core_type<tc>, window_params = [{transform_indices = @transform_0, window_bounds = array<i64: 1, 10, 10, 128>}, {pipeline_mode = #tpu.pipeline_mode<synchronous>, transform_indices = @transform_1, window_bounds = array<i64: 1, 1, 128>}, {transform_indices = @transform_2, window_bounds = array<i64: 1, 1>}, {pipeline_mode = #tpu.pipeline_mode<synchronous>, transform_indices = @transform_3, window_bounds = array<i64: 1152, 128>}, {pipeline_mode = #tpu.pipeline_mode<synchronous>, transform_indices = @transform_4, window_bounds = array<i64: 1, 128>}, {pipeline_mode = #tpu.pipeline_mode<synchronous>, transform_indices = @transform_5, window_bounds = array<i64: 1, 128>}, {pipeline_mode = #tpu.pipeline_mode<synchronous>, transform_indices = @transform_6, window_bounds = array<i64: 128, 32>}, {pipeline_mode = #tpu.pipeline_mode<synchronous>, transform_indices = @transform_7, window_bounds = array<i64: 1, 32>}, {pipeline_mode = #tpu.pipeline_mode<synchronous>, transform_indices = @transform_8, window_bounds = array<i64: 128, 8>}, {pipeline_mode = #tpu.pipeline_mode<synchronous>, transform_indices = @transform_9, window_bounds = array<i64: 8, 128>}, {transform_indices = @transform_10, window_bounds = array<i64: 1, 8, 8>}, {transform_indices = @transform_11, window_bounds = array<i64: 1, 128, 128>}, {transform_indices = @transform_12, window_bounds = array<i64: 1, 1, 32>}]} {
    %c0 = arith.constant 0 : index
    %c0_0 = arith.constant 0 : index
    %0 = memref.load %arg3[%c0, %c0_0] : memref<1x1xf32, #tpu.memory_space<smem>>
    %c0_1 = arith.constant 0 : index
    %c0_2 = arith.constant 0 : index
    %c0_3 = arith.constant 0 : index
    %c0_4 = arith.constant 0 : index
    %1 = vector.load %arg1[%c0_1, %c0_2, %c0_3, %c0_4] : memref<1x10x10x128xbf16, #tpu.memory_space<vmem>>, vector<1x10x10x128xbf16>
    %2 = vector.shape_cast %1 : vector<1x10x10x128xbf16> to vector<10x10x128xbf16>
    %3 = vector.extract_strided_slice %2 {offsets = [1, 1, 0], sizes = [8, 8, 128], strides = [1, 1, 1]} : vector<10x10x128xbf16> to vector<8x8x128xbf16>
    %4 = arith.extf %3 : vector<8x8x128xbf16> to vector<8x8x128xf32>
    %c0_5 = arith.constant 0 : index
    %c0_6 = arith.constant 0 : index
    %c0_7 = arith.constant 0 : index
    %5 = vector.load %arg2[%c0_5, %c0_6, %c0_7] : memref<1x1x128xf32, #tpu.memory_space<vmem>>, vector<1x1x128xf32>
    %6 = vector.broadcast %5 : vector<1x1x128xf32> to vector<8x8x128xf32>
    %7 = arith.mulf %4, %6 : vector<8x8x128xf32>
    %cst = arith.constant dense<0.000000e+00> : vector<8x8xf32>
    %8 = vector.multi_reduction <add>, %7, %cst [2] : vector<8x8x128xf32> to vector<8x8xf32>
    %9 = vector.broadcast %0 : f32 to vector<8x8xf32>
    %10 = arith.addf %8, %9 : vector<8x8xf32>
    %11 = vector.shape_cast %7 : vector<8x8x128xf32> to vector<64x128xf32>
    %cst_8 = arith.constant dense<0.000000e+00> : vector<64xf32>
    %12 = vector.multi_reduction <add>, %11, %cst_8 [1] : vector<64x128xf32> to vector<64xf32>
    %13 = vector.shape_cast %12 : vector<64xf32> to vector<64x1xf32>
    %14 = vector.broadcast %0 : f32 to vector<64x1xf32>
    %15 = arith.addf %13, %14 : vector<64x1xf32>
    %16 = arith.negf %15 : vector<64x1xf32>
    %17 = math.exp %16 : vector<64x1xf32>
    %cst_9 = arith.constant 1.000000e+00 : f32
    %18 = vector.broadcast %cst_9 : f32 to vector<64x1xf32>
    %19 = arith.addf %18, %17 : vector<64x1xf32>
    %20 = arith.divf %18, %19 : vector<64x1xf32>
    %21 = vector.extract_strided_slice %2 {offsets = [0, 0, 0], sizes = [8, 8, 128], strides = [1, 1, 1]} : vector<10x10x128xbf16> to vector<8x8x128xbf16>
    %22 = vector.shape_cast %21 : vector<8x8x128xbf16> to vector<64x128xbf16>
    %c0_10 = arith.constant 0 : index
    %c0_11 = arith.constant 0 : index
    %23 = vector.load %arg14[%c0_10, %c0_11] : memref<64x1152xbf16, #tpu.memory_space<vmem>>, vector<64x128xbf16>
    tpu.vector_store %arg14[%c0_10, %c0_11], %22 {strides = array<i32>} : memref<64x1152xbf16, #tpu.memory_space<vmem>>, vector<64x128xbf16>,
    %24 = vector.extract_strided_slice %2 {offsets = [0, 1, 0], sizes = [8, 8, 128], strides = [1, 1, 1]} : vector<10x10x128xbf16> to vector<8x8x128xbf16>
    %25 = vector.shape_cast %24 : vector<8x8x128xbf16> to vector<64x128xbf16>
    %c0_12 = arith.constant 0 : index
    %c128 = arith.constant 128 : index
    %26 = vector.load %arg14[%c0_12, %c128] : memref<64x1152xbf16, #tpu.memory_space<vmem>>, vector<64x128xbf16>
    tpu.vector_store %arg14[%c0_12, %c128], %25 {strides = array<i32>} : memref<64x1152xbf16, #tpu.memory_space<vmem>>, vector<64x128xbf16>,
    %27 = vector.extract_strided_slice %2 {offsets = [0, 2, 0], sizes = [8, 8, 128], strides = [1, 1, 1]} : vector<10x10x128xbf16> to vector<8x8x128xbf16>
    %28 = vector.shape_cast %27 : vector<8x8x128xbf16> to vector<64x128xbf16>
    %c0_13 = arith.constant 0 : index
    %c256 = arith.constant 256 : index
    %29 = vector.load %arg14[%c0_13, %c256] : memref<64x1152xbf16, #tpu.memory_space<vmem>>, vector<64x128xbf16>
    tpu.vector_store %arg14[%c0_13, %c256], %28 {strides = array<i32>} : memref<64x1152xbf16, #tpu.memory_space<vmem>>, vector<64x128xbf16>,
    %30 = vector.extract_strided_slice %2 {offsets = [1, 0, 0], sizes = [8, 8, 128], strides = [1, 1, 1]} : vector<10x10x128xbf16> to vector<8x8x128xbf16>
    %31 = vector.shape_cast %30 : vector<8x8x128xbf16> to vector<64x128xbf16>
    %c0_14 = arith.constant 0 : index
    %c384 = arith.constant 384 : index
    %32 = vector.load %arg14[%c0_14, %c384] : memref<64x1152xbf16, #tpu.memory_space<vmem>>, vector<64x128xbf16>
    tpu.vector_store %arg14[%c0_14, %c384], %31 {strides = array<i32>} : memref<64x1152xbf16, #tpu.memory_space<vmem>>, vector<64x128xbf16>,
    %33 = vector.extract_strided_slice %2 {offsets = [1, 1, 0], sizes = [8, 8, 128], strides = [1, 1, 1]} : vector<10x10x128xbf16> to vector<8x8x128xbf16>
    %34 = vector.shape_cast %33 : vector<8x8x128xbf16> to vector<64x128xbf16>
    %c0_15 = arith.constant 0 : index
    %c512 = arith.constant 512 : index
    %35 = vector.load %arg14[%c0_15, %c512] : memref<64x1152xbf16, #tpu.memory_space<vmem>>, vector<64x128xbf16>
    tpu.vector_store %arg14[%c0_15, %c512], %34 {strides = array<i32>} : memref<64x1152xbf16, #tpu.memory_space<vmem>>, vector<64x128xbf16>,
    %36 = vector.extract_strided_slice %2 {offsets = [1, 2, 0], sizes = [8, 8, 128], strides = [1, 1, 1]} : vector<10x10x128xbf16> to vector<8x8x128xbf16>
    %37 = vector.shape_cast %36 : vector<8x8x128xbf16> to vector<64x128xbf16>
    %c0_16 = arith.constant 0 : index
    %c640 = arith.constant 640 : index
    %38 = vector.load %arg14[%c0_16, %c640] : memref<64x1152xbf16, #tpu.memory_space<vmem>>, vector<64x128xbf16>
    tpu.vector_store %arg14[%c0_16, %c640], %37 {strides = array<i32>} : memref<64x1152xbf16, #tpu.memory_space<vmem>>, vector<64x128xbf16>,
    %39 = vector.extract_strided_slice %2 {offsets = [2, 0, 0], sizes = [8, 8, 128], strides = [1, 1, 1]} : vector<10x10x128xbf16> to vector<8x8x128xbf16>
    %40 = vector.shape_cast %39 : vector<8x8x128xbf16> to vector<64x128xbf16>
    %c0_17 = arith.constant 0 : index
    %c768 = arith.constant 768 : index
    %41 = vector.load %arg14[%c0_17, %c768] : memref<64x1152xbf16, #tpu.memory_space<vmem>>, vector<64x128xbf16>
    tpu.vector_store %arg14[%c0_17, %c768], %40 {strides = array<i32>} : memref<64x1152xbf16, #tpu.memory_space<vmem>>, vector<64x128xbf16>,
    %42 = vector.extract_strided_slice %2 {offsets = [2, 1, 0], sizes = [8, 8, 128], strides = [1, 1, 1]} : vector<10x10x128xbf16> to vector<8x8x128xbf16>
    %43 = vector.shape_cast %42 : vector<8x8x128xbf16> to vector<64x128xbf16>
    %c0_18 = arith.constant 0 : index
    %c896 = arith.constant 896 : index
    %44 = vector.load %arg14[%c0_18, %c896] : memref<64x1152xbf16, #tpu.memory_space<vmem>>, vector<64x128xbf16>
    tpu.vector_store %arg14[%c0_18, %c896], %43 {strides = array<i32>} : memref<64x1152xbf16, #tpu.memory_space<vmem>>, vector<64x128xbf16>,
    %45 = vector.extract_strided_slice %2 {offsets = [2, 2, 0], sizes = [8, 8, 128], strides = [1, 1, 1]} : vector<10x10x128xbf16> to vector<8x8x128xbf16>
    %46 = vector.shape_cast %45 : vector<8x8x128xbf16> to vector<64x128xbf16>
    %c0_19 = arith.constant 0 : index
    %c1024 = arith.constant 1024 : index
    %47 = vector.load %arg14[%c0_19, %c1024] : memref<64x1152xbf16, #tpu.memory_space<vmem>>, vector<64x128xbf16>
    tpu.vector_store %arg14[%c0_19, %c1024], %46 {strides = array<i32>} : memref<64x1152xbf16, #tpu.memory_space<vmem>>, vector<64x128xbf16>,
    %c0_20 = arith.constant 0 : index
    %c0_21 = arith.constant 0 : index
    %48 = vector.load %arg14[%c0_20, %c0_21] : memref<64x1152xbf16, #tpu.memory_space<vmem>>, vector<64x1152xbf16>
    %c0_22 = arith.constant 0 : index
    %c0_23 = arith.constant 0 : index
    %49 = vector.load %arg4[%c0_22, %c0_23] : memref<1152x128xbf16, #tpu.memory_space<vmem>>, vector<1152x128xbf16>
    %cst_24 = arith.constant dense<0.000000e+00> : vector<64x128xf32>
    %50 = tpu.matmul %48, %49, %cst_24 {dimension_numbers = #tpu.dot_dimension_numbers<[1], [0], [0], [1], [0, 0, 1, 1], [], []>} : vector<64x1152xbf16>, vector<1152x128xbf16>, vector<64x128xf32> -> vector<64x128xf32>
    %c0_25 = arith.constant 0 : index
    %c0_26 = arith.constant 0 : index
    %51 = vector.load %arg5[%c0_25, %c0_26] : memref<1x128xf32, #tpu.memory_space<vmem>>, vector<1x128xf32>
    %52 = vector.broadcast %51 : vector<1x128xf32> to vector<64x128xf32>
    %53 = arith.addf %50, %52 : vector<64x128xf32>
    %54 = vector.broadcast %20 : vector<64x1xf32> to vector<64x128xf32>
    %55 = arith.mulf %53, %54 : vector<64x128xf32>
    %c0_27 = arith.constant 0 : index
    %c0_28 = arith.constant 0 : index
    %56 = vector.load %arg6[%c0_27, %c0_28] : memref<1x128xf32, #tpu.memory_space<vmem>>, vector<1x128xf32>
    %57 = vector.broadcast %56 : vector<1x128xf32> to vector<64x128xf32>
    %58 = arith.mulf %55, %57 : vector<64x128xf32>
    %cst_29 = arith.constant dense<0.000000e+00> : vector<64xf32>
    %59 = vector.multi_reduction <add>, %58, %cst_29 [1] : vector<64x128xf32> to vector<64xf32>
    %60 = vector.shape_cast %59 : vector<64xf32> to vector<64x1xf32>
    %cst_30 = arith.constant dense<0xFF800000> : vector<1xf32>
    %61 = vector.multi_reduction <maximumf>, %60, %cst_30 [0] : vector<64x1xf32> to vector<1xf32>
    %62 = vector.shape_cast %61 : vector<1xf32> to vector<1x1xf32>
    %63 = vector.broadcast %62 : vector<1x1xf32> to vector<64x1xf32>
    %64 = arith.subf %60, %63 : vector<64x1xf32>
    %65 = math.exp %64 : vector<64x1xf32>
    %cst_31 = arith.constant dense<0.000000e+00> : vector<1xf32>
    %66 = vector.multi_reduction <add>, %65, %cst_31 [0] : vector<64x1xf32> to vector<1xf32>
    %67 = vector.shape_cast %66 : vector<1xf32> to vector<1x1xf32>
    %68 = vector.broadcast %67 : vector<1x1xf32> to vector<64x1xf32>
    %69 = arith.divf %65, %68 : vector<64x1xf32>
    %70 = vector.broadcast %69 : vector<64x1xf32> to vector<64x128xf32>
    %71 = arith.mulf %55, %70 : vector<64x128xf32>
    %cst_32 = arith.constant dense<0.000000e+00> : vector<128xf32>
    %72 = vector.multi_reduction <add>, %71, %cst_32 [0] : vector<64x128xf32> to vector<128xf32>
    %73 = vector.shape_cast %72 : vector<128xf32> to vector<1x128xf32>
    %74 = arith.truncf %73 : vector<1x128xf32> to vector<1x128xbf16>
    %c0_33 = arith.constant 0 : index
    %c0_34 = arith.constant 0 : index
    %75 = vector.load %arg7[%c0_33, %c0_34] : memref<128x32xbf16, #tpu.memory_space<vmem>>, vector<128x32xbf16>
    %cst_35 = arith.constant dense<0.000000e+00> : vector<1x32xf32>
    %76 = tpu.matmul %74, %75, %cst_35 {dimension_numbers = #tpu.dot_dimension_numbers<[1], [0], [0], [1], [0, 0, 1, 1], [], []>} : vector<1x128xbf16>, vector<128x32xbf16>, vector<1x32xf32> -> vector<1x32xf32>
    %c0_36 = arith.constant 0 : index
    %c0_37 = arith.constant 0 : index
    %77 = vector.load %arg8[%c0_36, %c0_37] : memref<1x32xf32, #tpu.memory_space<vmem>>, vector<1x32xf32>
    %78 = arith.addf %76, %77 : vector<1x32xf32>
    %c0_38 = arith.constant 0 : index
    %c0_39 = arith.constant 0 : index
    %c0_40 = arith.constant 0 : index
    %79 = vector.load %arg13[%c0_38, %c0_39, %c0_40] : memref<1x1x32xf32, #tpu.memory_space<vmem>>, vector<1x1x32xf32>
    %80 = vector.shape_cast %79 : vector<1x1x32xf32> to vector<1x32xf32>
    %81 = vector.shape_cast %78 : vector<1x32xf32> to vector<1x1x32xf32>
    tpu.vector_store %arg13[%c0_38, %c0_39, %c0_40], %81 {strides = array<i32>} : memref<1x1x32xf32, #tpu.memory_space<vmem>>, vector<1x1x32xf32>,
    %c0_41 = arith.constant 0 : index
    %c0_42 = arith.constant 0 : index
    %82 = vector.load %arg9[%c0_41, %c0_42] : memref<128x8xbf16, #tpu.memory_space<vmem>>, vector<128x8xbf16>
    %83 = arith.truncf %10 : vector<8x8xf32> to vector<8x8xbf16>
    %cst_43 = arith.constant dense<0.000000e+00> : vector<128x8xf32>
    %84 = tpu.matmul %82, %83, %cst_43 {dimension_numbers = #tpu.dot_dimension_numbers<[1], [0], [0], [1], [0, 0, 1, 1], [], []>} : vector<128x8xbf16>, vector<8x8xbf16>, vector<128x8xf32> -> vector<128x8xf32>
    %85 = arith.truncf %84 : vector<128x8xf32> to vector<128x8xbf16>
    %c0_44 = arith.constant 0 : index
    %c0_45 = arith.constant 0 : index
    %86 = vector.load %arg10[%c0_44, %c0_45] : memref<8x128xbf16, #tpu.memory_space<vmem>>, vector<8x128xbf16>
    %cst_46 = arith.constant dense<0.000000e+00> : vector<128x128xf32>
    %87 = tpu.matmul %85, %86, %cst_46 {dimension_numbers = #tpu.dot_dimension_numbers<[1], [0], [0], [1], [0, 0, 1, 1], [], []>} : vector<128x8xbf16>, vector<8x128xbf16>, vector<128x128xf32> -> vector<128x128xf32>
    %c0_47 = arith.constant 0 : index
    %c0_48 = arith.constant 0 : index
    %c0_49 = arith.constant 0 : index
    %88 = vector.load %arg12[%c0_47, %c0_48, %c0_49] : memref<1x128x128xf32, #tpu.memory_space<vmem>>, vector<1x128x128xf32>
    %89 = vector.shape_cast %88 : vector<1x128x128xf32> to vector<128x128xf32>
    %90 = vector.shape_cast %87 : vector<128x128xf32> to vector<1x128x128xf32>
    tpu.vector_store %arg12[%c0_47, %c0_48, %c0_49], %90 {strides = array<i32>} : memref<1x128x128xf32, #tpu.memory_space<vmem>>, vector<1x128x128xf32>,
    %91 = arith.negf %10 : vector<8x8xf32>
    %92 = math.exp %91 : vector<8x8xf32>
    %cst_50 = arith.constant 1.000000e+00 : f32
    %93 = vector.broadcast %cst_50 : f32 to vector<8x8xf32>
    %94 = arith.addf %93, %92 : vector<8x8xf32>
    %95 = arith.divf %93, %94 : vector<8x8xf32>
    %c0_51 = arith.constant 0 : index
    %c0_52 = arith.constant 0 : index
    %c0_53 = arith.constant 0 : index
    %96 = vector.load %arg11[%c0_51, %c0_52, %c0_53] : memref<1x8x8xf32, #tpu.memory_space<vmem>>, vector<1x8x8xf32>
    %97 = vector.shape_cast %96 : vector<1x8x8xf32> to vector<8x8xf32>
    %98 = vector.shape_cast %95 : vector<8x8xf32> to vector<1x8x8xf32>
    tpu.vector_store %arg11[%c0_51, %c0_52, %c0_53], %98 {strides = array<i32>} : memref<1x8x8xf32, #tpu.memory_space<vmem>>, vector<1x8x8xf32>,
    return
  }
  func.func @transform_0(%arg0: i32) -> (i32, i32, i32, i32) {
    %c0_i32 = arith.constant 0 : i32
    %c0_i32_0 = arith.constant 0 : i32
    %c0_i32_1 = arith.constant 0 : i32
    %c0_i32_2 = arith.constant 0 : i32
    return %arg0, %c0_i32, %c0_i32_0, %c0_i32_1 : i32, i32, i32, i32
  }
  func.func @transform_1(%arg0: i32) -> (i32, i32, i32) {
    %c0_i32 = arith.constant 0 : i32
    %c0_i32_0 = arith.constant 0 : i32
    %c0_i32_1 = arith.constant 0 : i32
    %c0_i32_2 = arith.constant 0 : i32
    return %c0_i32, %c0_i32_0, %c0_i32_1 : i32, i32, i32
  }
  func.func @transform_2(%arg0: i32) -> (i32, i32) {
    %c0_i32 = arith.constant 0 : i32
    %c0_i32_0 = arith.constant 0 : i32
    %c0_i32_1 = arith.constant 0 : i32
    return %c0_i32, %c0_i32_0 : i32, i32
  }
  func.func @transform_3(%arg0: i32) -> (i32, i32) {
    %c0_i32 = arith.constant 0 : i32
    %c0_i32_0 = arith.constant 0 : i32
    %c0_i32_1 = arith.constant 0 : i32
    return %c0_i32, %c0_i32_0 : i32, i32
  }
  func.func @transform_4(%arg0: i32) -> (i32, i32) {
    %c0_i32 = arith.constant 0 : i32
    %c0_i32_0 = arith.constant 0 : i32
    %c0_i32_1 = arith.constant 0 : i32
    return %c0_i32, %c0_i32_0 : i32, i32
  }
  func.func @transform_5(%arg0: i32) -> (i32, i32) {
    %c0_i32 = arith.constant 0 : i32
    %c0_i32_0 = arith.constant 0 : i32
    %c0_i32_1 = arith.constant 0 : i32
    return %c0_i32, %c0_i32_0 : i32, i32
  }
  func.func @transform_6(%arg0: i32) -> (i32, i32) {
    %c0_i32 = arith.constant 0 : i32
    %c0_i32_0 = arith.constant 0 : i32
    %c0_i32_1 = arith.constant 0 : i32
    return %c0_i32, %c0_i32_0 : i32, i32
  }
  func.func @transform_7(%arg0: i32) -> (i32, i32) {
    %c0_i32 = arith.constant 0 : i32
    %c0_i32_0 = arith.constant 0 : i32
    %c0_i32_1 = arith.constant 0 : i32
    return %c0_i32, %c0_i32_0 : i32, i32
  }
  func.func @transform_8(%arg0: i32) -> (i32, i32) {
    %c0_i32 = arith.constant 0 : i32
    %c0_i32_0 = arith.constant 0 : i32
    %c0_i32_1 = arith.constant 0 : i32
    return %c0_i32, %c0_i32_0 : i32, i32
  }
  func.func @transform_9(%arg0: i32) -> (i32, i32) {
    %c0_i32 = arith.constant 0 : i32
    %c0_i32_0 = arith.constant 0 : i32
    %c0_i32_1 = arith.constant 0 : i32
    return %c0_i32, %c0_i32_0 : i32, i32
  }
  func.func @transform_10(%arg0: i32) -> (i32, i32, i32) {
    %c0_i32 = arith.constant 0 : i32
    %c0_i32_0 = arith.constant 0 : i32
    %c0_i32_1 = arith.constant 0 : i32
    return %arg0, %c0_i32, %c0_i32_0 : i32, i32, i32
  }
  func.func @transform_11(%arg0: i32) -> (i32, i32, i32) {
    %c0_i32 = arith.constant 0 : i32
    %c0_i32_0 = arith.constant 0 : i32
    %c0_i32_1 = arith.constant 0 : i32
    return %arg0, %c0_i32, %c0_i32_0 : i32, i32, i32
  }
  func.func @transform_12(%arg0: i32) -> (i32, i32, i32) {
    %c0_i32 = arith.constant 0 : i32
    %c0_i32_0 = arith.constant 0 : i32
    %c0_i32_1 = arith.constant 0 : i32
    return %arg0, %c0_i32, %c0_i32_0 : i32, i32, i32
  }
}

</mosaic_0001>

<bundles_post_ra>
// kernel: tpu_custom_call.1
= control target key start
LH: loop header
LB: loop body
LE: loop exit
PB: predicated region body
PF: predicated region fallthrough
CT: control target
= control target key end

     0   :  { %s5121_s0 = inlined_call_operand.vmem [shape: bf16[2,10,10,128], index: 0, kind: input, shape index: {}]   ;;  %s5122_s1 = inlined_call_operand.vmem [shape: f32[1,1,128], index: 1, kind: input, shape index: {}]   ;;  %s5123_s2 = inlined_call_operand.<no memory space> [shape: f32[1,1], index: 2, kind: input, shape index: {}]   ;;  %s5124_s3 = inlined_call_operand.hbm [shape: bf16[1152,128], index: 3, kind: input, shape index: {}]   ;;  %s5125_s4 = inlined_call_operand.vmem [shape: f32[1,128], index: 4, kind: input, shape index: {}]   ;;  %s5126_s5 = inlined_call_operand.vmem [shape: f32[1,128], index: 5, kind: input, shape index: {}]   ;;  %s5127_s6 = inlined_call_operand.vmem [shape: bf16[128,32], index: 6, kind: input, shape index: {}]   ;;  %s5128_s7 = inlined_call_operand.vmem [shape: f32[1,32], index: 7, kind: input, shape index: {}]   ;;  %s5129_s8 = inlined_call_operand.vmem [shape: bf16[128,8], index: 8, kind: input, shape index: {}]   ;;  %s5130_s9 = inlined_call_operand.vmem [shape: bf16[8,128], index: 9, kind: input, shape index: {}]   ;;  %s5131_s10 = inlined_call_operand.hbm [shape: f32[2,8,8], index: 10, kind: output, shape index: {0}]   ;;  %s5132_s11 = inlined_call_operand.hbm [shape: f32[2,128,128], index: 11, kind: output, shape index: {1}]   ;;  %s5133_s12 = inlined_call_operand.hbm [shape: f32[2,1,32], index: 12, kind: output, shape index: {2}]  }
   0x1   :  { %5154 = sst [smem:[#allocation31_spill]] %s5121_s0 }
   0x2   :  { %5155 = sst [smem:[#allocation32_spill]] %s5122_s1 }
   0x3   :  { %5156 = sst [smem:[#allocation33_spill]] %s5124_s3 }
   0x4   :  { %5157 = sst [smem:[#allocation34_spill]] %s5125_s4 }
   0x5   :  { %18 = sst [smem:[#allocation3]] %s5123_s2 }
   0x6   :  { %19 = vsyncpa [#allocation5], 0 }
   0x7   :  { %20 = vsyncpa [#allocation6], 0 }
   0x8   :  { %22 = vsyncpa [#allocation6 + $0x1], 0 }
   0x9   :  { %23 = vsyncpa [#allocation9], 0 }
   0xa   :  { %25 = vsyncpa [#allocation9 + $0x1], 0  ;;  %s4205_s23 = smov 0   ;;  %s4207_s24 = smov 0  }
   0xb   :  { %s4209_s25 = smov 0   ;;  %s4211_s26 = smov 0  }
   0xc LB: > { %s4226_s2 = sadd.s32 4294967295, %s4125_s26   ;;  %s5152_s27 = sadd.s32 4294967294, %s4125_s26   ;;  %s4125_s26 = sphi %s4211_s26, %s5209_s26   ;;  %s4121_s25 = sphi %s4209_s25, %s5208_s25   ;;  %s4117_s24 = sphi %s4207_s24, %s5207_s24   ;;  %s4113_s23 = sphi %s4205_s23, %s5206_s23  }
   0xd   : > { %s4230_s28 = sadd.s32 1, %s4125_s26   ;;  %s253_s29 = sadd.s32 1, %s4121_s25 }
   0xe   : > { %s250_s30 = ssub.s32 %s4125_s26, %s4230_s28  ;;  %p263_p0 = scmp.ne.s32.totalorder %s4121_s25, %s4117_s24 }
   0xf   : > { %p251_p1 = scmp.eq.s32.totalorder %s250_s30, 0  ;;  %p264_p2 = scmp.eq.s32.totalorder %s4226_s2, 1 }
  0x10   : > { %p269_p3 = scmp.ne.s32.totalorder %s4117_s24, %s4113_s23  ;;  %p270_p4 = scmp.eq.s32.totalorder %s5152_s27, 1 }
  0x11   : > { %s4243_s13 = scalar_select %p251_p1, %s4121_s25, %s253_s29  }
  0x12   : > { %p4245_p5 = por %p264_p2, %p263_p0  ;;  %p4249_p6 = por %p270_p4, %p269_p3 }
  0x13   : > { %p3183_p7 = scmp.ge.s32.totalorder %s4125_s26, 1  ;;  %p329_p8 = scmp.lt.s32.totalorder %s4125_s26, 3 }
  0x14   : > { %s5159_s15 = scalar_select %p4249_p6, 1, 0 }
  0x15   : > { %p3683_p9 = scmp.eq.s32.totalorder %s4226_s2, 0  ;;  %p4256_p10 = pnand %p3183_p7, %p329_p8 }
  0x16   : > { %s4127_s17 = smov [#allocation4]  }
  0x17   : > { %s347_s18 = sshll.u32 %s4127_s17, 4  ;;  %p3669_p11 = pneg %p4256_p10  ;;  %s348_s18 = int_to_ptr.vmem [resolvable:$true] %s347_s18 }
  0x18   : > { %s3990_s19 = scalar_lea.vmem %s348_s18, 9216  ;;  %p3998_p3 = scmp.lt.s32.totalorder %s348_s18, %s348_s18 }
  0x19   : > { %p3670_p12 = pnand %p3683_p9, %p3669_p11  ;;  %p3991_p0 = scmp.ne.s32.totalorder %s348_s18, %s3990_s19 }
  0x1a   : > { %p3999_p4 = scmp.lt.s32.totalorder %s3990_s19, %s3990_s19 }
  0x1b   : > { %p3981_p13 = pneg %p3670_p12 }
  0x1c   : > { %p4000_p6 = por %p3999_p4, %p3998_p3 }
  0x1d   : > { %p3993_p1 = pnand %p3991_p0, %p3981_p13 }
  0x1f   : > { %p3994_p2 = pneg %p3993_p1 }
  0x21   : > { %p4001_p7 = pnand %p4000_p6, %p3994_p2 }
  0x23   : > { %4004 = shalt.err (!%p4001_p7)
}
  0x24   : > { %s4128_s20 = smov 64   ;;  %s4129_s21 = smov 4  }
  0x25   : > { %s5161_s3 = sld [smem:[#allocation33_spill]] }
  0x27   : > { %389 = sbr.rel (%p4256_p10) target bundleno = 1085 (0x43d), region = 60 }
  0x2b   : > { %3672 = dma.hbm_to_vmem [thread:$0]  (!%p3670_p12), %s5161_s3, 9216, %s348_s18, [#allocation5], %s4128_s20, %s4128_s20, %s4129_s21  }
  0x2c   : > { %4100 = dma.done.wait (%p3683_p9), [#allocation5], 9216  }
  0x2d   : > { %4102 = vsyncadd (%p3683_p9), [#allocation5], 4294958080  ;;  %v3725_v0 = vld [vmem:[#allocation4 + $0x78] sm:$0xff]   ;;  %v3729_v4 = vld [vmem:[#allocation4 + $0x70] sm:$0xff]   ;;  %p440_p6 = scmp.lt.s32.totalorder %s4226_s2, 1  ;;  %s5162_s0 = sld [smem:[#allocation31_spill]] }
  0x2e   : > { %v3726_v1 = vld [vmem:[#allocation4 + $0x38] sm:$0xff]   ;;  %3377 = vmatprep.subr.bf16.mxu0 %v3725_v0  ;;  %v3730_v5 = vld [vmem:[#allocation4 + $0x30] sm:$0xff]   ;;  %v3733_v8 = vld [vmem:[#allocation4 + $0x68] sm:$0xff]   ;;  %vm702_vm0 = vsmask.f32 3328  ;;  %vm849_vm2 = vcmask 1042432  }
  0x2f   : > { %v3727_v2 = vld [vmem:[#allocation4 + $0xf8] sm:$0xff]   ;;  %3378 = vmatpush3.bf16.msra.mxu0 %v3726_v1  ;;  %v3731_v6 = vld [vmem:[#allocation4 + $0xf0] sm:$0xff]   ;;  %v3734_v9 = vld [vmem:[#allocation4 + $0x28] sm:$0xff]   ;;  %s441_s30 = scalar_select %p440_p6, %s4226_s2, 1  ;;  %vm703_vm1 = vsmask.f32 7440 }
  0x30   : > { %v3728_v3 = vld [vmem:[#allocation4 + $0xb8] sm:$0xff]   ;;  %3417 = vmatprep.subr.bf16.mxu1 %v3727_v2  ;;  %3379 = vmatprep.subr.bf16.mxu0 %v3729_v4  ;;  %v3732_v7 = vld [vmem:[#allocation4 + $0xb0] sm:$0xff]   ;;  %v3735_v10 = vld [vmem:[#allocation4 + $0xe8] sm:$0xff]   ;;  %vm850_vm3 = vcmask 1046532   ;;  %vm589_vm6 = vcmask 1046528   ;;  %s5167_s1 = sld [smem:[#allocation32_spill]] }
  0x31   : > { %3418 = vmatpush3.bf16.msra.mxu1 %v3728_v3  ;;  %v3736_v11 = vld [vmem:[#allocation4 + $0xa8] sm:$0xff]   ;;  %v3737_v12 = vld [vmem:[#allocation4 + $0x60] sm:$0xff]   ;;  %v3741_v16 = vld [vmem:[#allocation4 + $0x58] sm:$0xff]   ;;  %s3658_s16 = smul.u32 80, %s441_s30  ;;  %s446_s22 = sld [smem:[#allocation3]]  ;;  %vm506_vm7 = vcmask 1047553  }
  0x32   : > { %3419 = vmatprep.subr.bf16.mxu1 %v3731_v6  ;;  %v3738_v13 = vld [vmem:[#allocation4 + $0x20] sm:$0xff]   ;;  %v3742_v17 = vld [vmem:[#allocation4 + $0x18] sm:$0xff]   ;;  %v3745_v20 = vld [vmem:[#allocation4 + $0x50] sm:$0xff]   ;;  %s5185_s4 = sld [smem:[#allocation34_spill]]  ;;  %vm510_vm8 = vcmask 1040384   ;;  %vm4131_vm9 = vmmov 0  }
  0x33   : > { %3380 = vmatpush3.bf16.msra.mxu0 %v3730_v5  ;;  %v3739_v14 = vld [vmem:[#allocation4 + $0xe0] sm:$0xff]   ;;  %v3743_v18 = vld [vmem:[#allocation4 + $0xd8] sm:$0xff]   ;;  %v3746_v21 = vld [vmem:[#allocation4 + $0x10] sm:$0xff]   ;;  %s4278_s19 = scalar_lea.vmem %s5162_s0, %s3658_s16  ;;  %vm2451_vm10 = vcmask 121912   ;;  %vm2516_vm11 = vcmask 1041409   ;;  %vm2518_vm12 = vcmask 1042434  }
  0x34   : > { %3381 = vmatprep.subr.bf16.mxu0 %v3733_v8  ;;  %v3740_v15 = vld [vmem:[#allocation4 + $0xa0] sm:$0xff]   ;;  %v3744_v19 = vld [vmem:[#allocation4 + $0x98] sm:$0xff]   ;;  %v3747_v22 = vld [vmem:[#allocation4 + $0xd0] sm:$0xff]   ;;  %vm2520_vm13 = vcmask 1043459   ;;  %vm2522_vm14 = vcmask 1044484   ;;  %vm2524_vm15 = vcmask 1045509  }
  0x35   : > { %3420 = vmatpush3.bf16.msra.mxu1 %v3732_v7  ;;  %v3748_v23 = vld [vmem:[#allocation4 + $0x90] sm:$0xff]   ;;  %v3749_v24 = vld [vmem:[#allocation4 + $0x48] sm:$0xff]   ;;  %v3753_v28 = vld [vmem:[#allocation4 + $0x40] sm:$0xff]   ;;  %s4910_s16 = sand.u32 1, %s4117_s24   ;;  %s3370_s30 = sshll.u32 %s4226_s2, 7 }
  0x36   : > { %3421 = vmatprep.subr.bf16.mxu1 %v3735_v10  ;;  %v3750_v25 = vld [vmem:[#allocation4 + $0x8] sm:$0xff]   ;;  %v3754_v29 = vld [vmem:[#allocation4] sm:$0xff]   ;;  %v3760_v46 = vld [vmem:[#allocation4 + $0x178] sm:$0xff]   ;;  %s3188_s17 = sshll.u32 %s4910_s16, 3  ;;  %s5153_s29 = scalar_lea.vmem [#allocation10], %s4910_s16 }
  0x37   : > { %3382 = vmatpush3.bf16.msra.mxu0 %v3734_v9  ;;  %v3751_v26 = vld [vmem:[#allocation4 + $0xc8] sm:$0xff]   ;;  %v3755_v30 = vld [vmem:[#allocation4 + $0xc0] sm:$0xff]   ;;  %vm4295_vm4 = vmor %vm849_vm2, %vm850_vm3  ;;  %vm2556_vm2 = vcmask 1043456   ;;  %vm2998_vm3 = vcmask 64513   ;;  %s4930_s18 = scalar_lea.vmem [#allocation7], %s3188_s17  ;;  %s3003_s21 = scalar_lea.sflag [#allocation6], %s4910_s16 }
  0x38   : > { %3383 = vmatprep.subr.bf16.mxu0 %v3737_v12  ;;  %v3752_v27 = vld [vmem:[#allocation4 + $0x88] sm:$0xff]   ;;  %v447_v31 = vld [vmem:[%s4278_s19] sm:$0xf]  ;;  %v448_v32 = vld [vmem:[%s4278_s19 + $0x4] sm:$0x1]  ;;  %s3025_s20 = sshll.u32 %s4930_s18, 4  ;;  %s3026_s20 = int_to_ptr.vmem [resolvable:$true] %s3025_s20 }
  0x39   : > { %3422 = vmatpush3.bf16.msra.mxu1 %v3736_v11  ;;  %v4283_v33 = vld [vmem:[%s4278_s19 + $0x8] sm:$0xf]  ;;  %v4286_v34 = vld [vmem:[%s4278_s19 + $0xc] sm:$0x1]  ;;  %694 = vst [vmem:[#allocation2] sm:$0xf] %v447_v31  ;;  %vm4301_vm5 = vmor %vm702_vm0, %vm703_vm1 }
  0x3a   : > { %3423 = vmatprep.subr.bf16.mxu1 %v3739_v14  ;;  %695 = vst [vmem:[#allocation2 + $0x24] sm:$0xf] %v4283_v33  ;;  %v706_v35 = vshrl.u32 %v447_v31, 16  ;;  %v709_v36 = vshll.u32 %v447_v31, 16  ;;  %v715_v37 = vshll.u32 %v448_v32, 16  ;;  %v720_v38 = vshrl.u32 %v4283_v33, 16 }
  0x3b   : > { %3384 = vmatpush3.bf16.msra.mxu0 %v3738_v13  ;;  %900 = vst [vmem:[#allocation2 + $0xc] sm:$0xf] %v4283_v33  ;;  %v723_v39 = vshll.u32 %v4283_v33, 16  ;;  %v729_v40 = vshll.u32 %v4286_v34, 16  ;;  %v3759_v45 = vld [vmem:[#allocation4 + $0x80] sm:$0xff]   ;;  %v3200_v53 = vrot.slane %v447_v31, 9 }
  0x3c   : > { %3385 = vmatprep.subr.bf16.mxu0 %v3741_v16  ;;  %v708_v41 = vrot.slane %v706_v35, 4  ;;  %v711_v42 = vrot.slane %v709_v36, 5  ;;  %v717_v43 = vrot.slane %v715_v37, 5  ;;  %v722_v44 = vrot.slane %v720_v38, 4  ;;  %v4306_v52 = vld [vmem:[%s4278_s19 + $0x10] sm:$0xf] }
  0x3d   : > { %3424 = vmatpush3.bf16.msra.mxu1 %v3740_v15  ;;  %v725_v47 = vrot.slane %v723_v39, 5  ;;  %v731_v48 = vrot.slane %v729_v40, 5  ;;  %v854_v54 = vrot.slane %v448_v32, 5  ;;  %v3201_v55 = vrot.slane %v4283_v33, 9  ;;  %901 = vst [vmem:[#allocation2 + $0x30] sm:$0xf] %v4306_v52 }
  0x3e   : > { %3425 = vmatprep.subr.bf16.mxu1 %v3743_v18  ;;  %v712_v51 = vor.u32 %v711_v42, %v708_v41  ;;  %v858_v57 = vrot.slane %v4286_v34, 5  ;;  %696 = vst [vmem:[#allocation2 + $0x48] sm:$0xf] %v4306_v52  ;;  %946 = vst [vmem:[#allocation2 + $0x18] sm:$0xf] %v4306_v52  ;;  %v3765_v58 = vld [vmem:[#allocation4 + $0x1f8] sm:$0xff]  }
  0x3f   : > { %3386 = vmatpush3.bf16.msra.mxu0 %v3742_v17  ;;  %v726_v56 = vor.u32 %v725_v47, %v722_v44  ;;  %v855_v60 = vsel %vm4295_vm4, %v3200_v53, %v854_v54  ;;  %v734_v1 = vshrl.u32 %v4306_v52, 16  ;;  %v4323_v2 = vld [vmem:[%s4278_s19 + $0x14] sm:$0x1]  ;;  %v737_v3 = vshll.u32 %v4306_v52, 16  ;;  %v4327_v4 = vld [vmem:[%s4278_s19 + $0x18] sm:$0xf] }
  0x40   : > { %3387 = vmatprep.subr.bf16.mxu0 %v3745_v20  ;;  %v713_v59 = vrot.slane %v712_v51, 4  ;;  %v859_v62 = vsel %vm4295_vm4, %v3201_v55, %v858_v57  ;;  %892 = vst [vmem:[#allocation2 + $0x8] sm:$0xf] %v855_v60  ;;  %v4330_v5 = vld [vmem:[%s4278_s19 + $0x1c] sm:$0x1]  ;;  %v743_v7 = vshll.u32 %v4323_v2, 16 }
  0x41   : > { %3426 = vmatpush3.bf16.msra.mxu1 %v3744_v19  ;;  %v727_v61 = vrot.slane %v726_v56, 4  ;;  %893 = vst [vmem:[#allocation2 + $0x2c] sm:$0xf] %v859_v62  ;;  %938 = vst [vmem:[#allocation2 + $0x14] sm:$0xf] %v859_v62  ;;  %v736_v6 = vrot.slane %v734_v1, 4 }
  0x42   : > { %3427 = vmatprep.subr.bf16.mxu1 %v3747_v22  ;;  %v718_v63 = vsel %vm4301_vm5, %v713_v59, %v717_v43  ;;  %697 = vst [vmem:[#allocation2 + $0x6c] sm:$0xf] %v4327_v4  ;;  %v739_v8 = vrot.slane %v737_v3, 5  ;;  %v748_v9 = vshrl.u32 %v4327_v4, 16  ;;  %v751_v10 = vshll.u32 %v4327_v4, 16  ;;  %v3766_v12 = vld [vmem:[#allocation4 + $0x1b8] sm:$0xff]  }
  0x43   : > { %3388 = vmatpush3.bf16.msra.mxu0 %v3746_v21  ;;  %v732_v0 = vsel %vm4301_vm5, %v727_v61, %v731_v48  ;;  %825 = vst [vmem:[#allocation2 + $0x4] sm:$0xf] %v718_v63  ;;  %v757_v11 = vshll.u32 %v4330_v5, 16  ;;  %902 = vst [vmem:[#allocation2 + $0x54] sm:$0xf] %v4327_v4  ;;  %v3769_v13 = vld [vmem:[#allocation4 + $0x1f0] sm:$0xff]  }
  0x44   : > { %3389 = vmatprep.subr.bf16.mxu0 %v3749_v24  ;;  %826 = vst [vmem:[#allocation2 + $0x28] sm:$0xf] %v732_v0  ;;  %923 = vst [vmem:[#allocation2 + $0x10] sm:$0xf] %v732_v0  ;;  %v740_v14 = vor.u32 %v739_v8, %v736_v6  ;;  %v745_v15 = vrot.slane %v743_v7, 5  ;;  %v750_v16 = vrot.slane %v748_v9, 4 }
  0x45   : > { %3428 = vmatpush3.bf16.msra.mxu1 %v3748_v23  ;;  %947 = vst [vmem:[#allocation2 + $0x3c] sm:$0xf] %v4327_v4  ;;  %v753_v17 = vrot.slane %v751_v10, 5  ;;  %v3763_v19 = vld [vmem:[#allocation2 + $0xc] ss:$36 sps:$4 sm:$0xff]   ;;  %v3764_v20 = vld [vmem:[#allocation4 + $0x138] sm:$0xff]  }
  0x46   : > { %3429 = vmatprep.subr.bf16.mxu1 %v3751_v26  ;;  %v3202_v21 = vrot.slane %v4306_v52, 9  ;;  %v3767_v22 = vld [vmem:[#allocation4 + $0x170] sm:$0xff]   ;;  %v741_v23 = vrot.slane %v740_v14, 4  ;;  %v4341_v26 = vld [vmem:[%s4278_s19 + $0x20] sm:$0xf]  ;;  %1896 = vmatprep.mubr.bf16.mxu1 %v3763_v19  ;;  %v866_v36 = vrot.slane %v4330_v5, 5 }
  0x47   : > { %3390 = vmatpush3.bf16.msra.mxu0 %v3750_v25  ;;  %v754_v24 = vor.u32 %v753_v17, %v750_v16  ;;  %v759_v25 = vrot.slane %v757_v11, 5  ;;  %903 = vst [vmem:[#allocation2 + $0x78] sm:$0xf] %v4341_v26  ;;  %698 = vst [vmem:[#allocation2 + $0x90] sm:$0xf] %v4341_v26  ;;  %v3772_v37 = vld [vmem:[#allocation4 + $0x1b0] sm:$0xff]  }
  0x48   : > { %3391 = vmatprep.subr.bf16.mxu0 %v3753_v28  ;;  %v3761_v18 = vld [vmem:[#allocation2 + $0x8] ss:$36 sps:$4 sm:$0xff]   ;;  %v3756_v28 = vld [vmem:[#allocation2] ss:$36 sps:$4 sm:$0xff]   ;;  %948 = vst [vmem:[#allocation2 + $0x60] sm:$0xf] %v4341_v26  ;;  %v746_v31 = vsel %vm4301_vm5, %v741_v23, %v745_v15 }
  0x49   : > { %3430 = vmatpush3.bf16.msra.mxu1 %v3752_v27  ;;  %v862_v27 = vrot.slane %v4323_v2, 5  ;;  %v755_v32 = vrot.slane %v754_v24, 4  ;;  %827 = vst [vmem:[#allocation2 + $0x4c] sm:$0xf] %v746_v31  ;;  %924 = vst [vmem:[#allocation2 + $0x34] sm:$0xf] %v746_v31 }
  0x4a   : > { %3431 = vmatprep.subr.bf16.mxu1 %v3755_v30  ;;  %v3203_v30 = vrot.slane %v4327_v4, 9  ;;  %969 = vst [vmem:[#allocation2 + $0x1c] sm:$0xf] %v746_v31  ;;  %v762_v38 = vshrl.u32 %v4341_v26, 16  ;;  %v3779_v41 = vld [vmem:[#allocation4 + $0x1e8] sm:$0xff]   ;;  %v765_v42 = vshll.u32 %v4341_v26, 16 }
  0x4b   : > { %3392 = vmatpush3.bf16.msra.mxu0 %v3754_v29  ;;  %v3758_v29 = vld [vmem:[#allocation2 + $0x4] ss:$36 sps:$4 sm:$0xff]   ;;  %v863_v35 = vsel %vm4295_vm4, %v3202_v21, %v862_v27  ;;  %v760_v39 = vsel %vm4301_vm5, %v755_v32, %v759_v25  ;;  %v3768_v43 = vld [vmem:[#allocation4 + $0x130] sm:$0xff]   ;;  %v4366_v57 = vld [vmem:[%s4278_s19 + $0x2c] sm:$0x1]  ;;  %v3204_v61 = vrot.slane %v4341_v26, 9 }
  0x4c   : > { %3457 = vmatprep.subr.bf16.mxu0 %v3760_v46  ;;  %1831 = vmatprep.mubr.bf16.mxu0 %v3758_v29  ;;  %894 = vst [vmem:[#allocation2 + $0x50] sm:$0xf] %v863_v35  ;;  %939 = vst [vmem:[#allocation2 + $0x38] sm:$0xf] %v863_v35  ;;  %v867_v40 = vsel %vm4295_vm4, %v3203_v30, %v866_v36  ;;  %v764_v44 = vrot.slane %v762_v38, 4  ;;  %v767_v46 = vrot.slane %v765_v42, 5 }
  0x4d   : > { %3432 = vmatpush3.bf16.msra.mxu1 %v3759_v45  ;;  %984 = vst [vmem:[#allocation2 + $0x20] sm:$0xf] %v863_v35  ;;  %828 = vst [vmem:[#allocation2 + $0x70] sm:$0xf] %v760_v39  ;;  %v3774_v45 = vld [vmem:[#allocation4 + $0x168] sm:$0xff]   ;;  %v3781_v51 = vld [vmem:[#allocation4 + $0x160] sm:$0xff]  }
  0x4e   : > { %3497 = vmatprep.subr.bf16.mxu1 %v3765_v58  ;;  %1832 = vmatmul.mubr.bf16.vlgmr.msra.gmra.mxu0 %v3756_v28  ;;  %925 = vst [vmem:[#allocation2 + $0x58] sm:$0xf] %v760_v39  ;;  %970 = vst [vmem:[#allocation2 + $0x40] sm:$0xf] %v760_v39  ;;  %v3777_v47 = vld [vmem:[#allocation4 + $0x128] sm:$0xff]   ;;  %v3783_v53 = vld [vmem:[#allocation4 + $0x1e0] sm:$0xff]   ;;  %v768_v56 = vor.u32 %v767_v46, %v764_v44 }
  0x4f   : > { %3458 = vmatpush3.bf16.msra.mxu0 %v3764_v20  ;;  %895 = vst [vmem:[#allocation2 + $0x74] sm:$0xf] %v867_v40  ;;  %940 = vst [vmem:[#allocation2 + $0x5c] sm:$0xf] %v867_v40  ;;  %v3780_v48 = vld [vmem:[#allocation4 + $0x1a8] sm:$0xff]   ;;  %v785_v63 = vshll.u32 %v4366_v57, 16 }
  0x50   : > { %1897 = vmatmul.mubr.bf16.vlgmr.msra.gmra.mxu1 %v3761_v18  ;;  %985 = vst [vmem:[#allocation2 + $0x44] sm:$0xf] %v867_v40  ;;  %3459 = vmatprep.subr.bf16.mxu0 %v3767_v22  ;;  %v4360_v54 = vld [vmem:[%s4278_s19 + $0x24] sm:$0x1]  ;;  %v4363_v55 = vld [vmem:[%s4278_s19 + $0x28] sm:$0xf] }
  0x51   : > { %3498 = vmatpush3.bf16.msra.mxu1 %v3766_v12  ;;  %699 = vst [vmem:[#allocation2 + $0xb4] sm:$0xf] %v4363_v55  ;;  %v771_v58 = vshll.u32 %v4360_v54, 16  ;;  %v776_v59 = vshrl.u32 %v4363_v55, 16  ;;  %v779_v60 = vshll.u32 %v4363_v55, 16  ;;  %v769_v62 = vrot.slane %v768_v56, 4 }
  0x52   : > { %3499 = vmatprep.subr.bf16.mxu1 %v3769_v13  ;;  %904 = vst [vmem:[#allocation2 + $0x9c] sm:$0xf] %v4363_v55  ;;  %949 = vst [vmem:[#allocation2 + $0x84] sm:$0xf] %v4363_v55  ;;  %v3782_v0 = vld [vmem:[#allocation4 + $0x120] sm:$0xff]   ;;  %v787_v10 = vrot.slane %v785_v63, 5 }
  0x53   : > { %3460 = vmatpush3.bf16.msra.mxu0 %v3768_v43  ;;  %v773_v1 = vrot.slane %v771_v58, 5  ;;  %v778_v3 = vrot.slane %v776_v59, 4  ;;  %v781_v6 = vrot.slane %v779_v60, 5  ;;  %v3786_v7 = vld [vmem:[#allocation4 + $0x1a0] sm:$0xff]   ;;  %v3773_v9 = vld [vmem:[#allocation2 + $0x48] ss:$36 sps:$4 sm:$0xff]  }
  0x54   : > { %3461 = vmatprep.subr.bf16.mxu0 %v3774_v45  ;;  %v3770_v8 = vld [vmem:[#allocation2 + $0x4c] ss:$36 sps:$4 sm:$0xff]   ;;  %v3788_v11 = vld [vmem:[#allocation4 + $0x158] sm:$0xff]   ;;  %v870_v16 = vrot.slane %v4360_v54, 5  ;;  %v3205_v20 = vrot.slane %v4363_v55, 9  ;;  %v874_v21 = vrot.slane %v4366_v57, 5 }
  0x55   : > { %3500 = vmatpush3.bf16.msra.mxu1 %v3772_v37  ;;  %v3775_v12 = vld [vmem:[#allocation2 + $0x54] ss:$36 sps:$4 sm:$0xff]   ;;  %v774_v14 = vsel %vm4301_vm5, %v769_v62, %v773_v1  ;;  %v782_v15 = vor.u32 %v781_v6, %v778_v3  ;;  %1839 = vmatprep.mubr.bf16.mxu0 %v3770_v8  ;;  %v4380_v17 = vld [vmem:[%s4278_s19 + $0x30] sm:$0xf]  ;;  %v4403_v40 = vld [vmem:[%s4278_s19 + $0x3c] sm:$0x1] }
  0x56   : > { %3501 = vmatprep.subr.bf16.mxu1 %v3779_v41  ;;  %v3778_v13 = vld [vmem:[#allocation2 + $0x50] ss:$36 sps:$4 sm:$0xff]   ;;  %829 = vst [vmem:[#allocation2 + $0x94] sm:$0xf] %v774_v14  ;;  %926 = vst [vmem:[#allocation2 + $0x7c] sm:$0xf] %v774_v14  ;;  %1840 = vmatmul.mubr.bf16.gmra.mxu0 %v3773_v9  ;;  %v871_v19 = vsel %vm4295_vm4, %v3204_v61, %v870_v16  ;;  %v875_v24 = vsel %vm4295_vm4, %v3205_v20, %v874_v21 }
  0x57   : > { %3462 = vmatpush3.bf16.msra.mxu0 %v3777_v47  ;;  %971 = vst [vmem:[#allocation2 + $0x64] sm:$0xf] %v774_v14  ;;  %1904 = vmatprep.mubr.bf16.mxu1 %v3775_v12  ;;  %v783_v18 = vrot.slane %v782_v15, 4  ;;  %905 = vst [vmem:[#allocation2 + $0xc0] sm:$0xf] %v4380_v17  ;;  %v3791_v22 = vld [vmem:[#allocation4 + $0x118] sm:$0xff]  }
  0x58   : > { %3463 = vmatprep.subr.bf16.mxu0 %v3781_v51  ;;  %700 = vst [vmem:[#allocation2 + $0xd8] sm:$0xf] %v4380_v17  ;;  %950 = vst [vmem:[#allocation2 + $0xa8] sm:$0xf] %v4380_v17  ;;  %1905 = vmatmul.mubr.bf16.gmra.mxu1 %v3778_v13  ;;  %v3793_v25 = vld [vmem:[#allocation4 + $0x1d8] sm:$0xff]   ;;  %v790_v27 = vshrl.u32 %v4380_v17, 16 }
  0x59   : > { %3502 = vmatpush3.bf16.msra.mxu1 %v3780_v48  ;;  %896 = vst [vmem:[#allocation2 + $0x98] sm:$0xf] %v871_v19  ;;  %986 = vst [vmem:[#allocation2 + $0x68] sm:$0xf] %v871_v19  ;;  %v788_v23 = vsel %vm4301_vm5, %v783_v18, %v787_v10  ;;  %v3794_v28 = vld [vmem:[#allocation4 + $0x198] sm:$0xff]   ;;  %v793_v29 = vshll.u32 %v4380_v17, 16 }
  0x5a   : > { %3503 = vmatprep.subr.bf16.mxu1 %v3783_v53  ;;  %941 = vst [vmem:[#allocation2 + $0x80] sm:$0xf] %v871_v19  ;;  %830 = vst [vmem:[#allocation2 + $0xb8] sm:$0xf] %v788_v23  ;;  %v3795_v30 = vld [vmem:[#allocation4 + $0x150] sm:$0xff]   ;;  %v792_v31 = vrot.slane %v790_v27, 4 }
  0x5b   : > { %3464 = vmatpush3.bf16.msra.mxu0 %v3782_v0  ;;  %927 = vst [vmem:[#allocation2 + $0xa0] sm:$0xf] %v788_v23  ;;  %972 = vst [vmem:[#allocation2 + $0x88] sm:$0xf] %v788_v23  ;;  %v3796_v32 = vld [vmem:[#allocation4 + $0x110] sm:$0xff]   ;;  %v795_v35 = vrot.slane %v793_v29, 5 }
  0x5c   : > { %3465 = vmatprep.subr.bf16.mxu0 %v3788_v11  ;;  %897 = vst [vmem:[#allocation2 + $0xbc] sm:$0xf] %v875_v24  ;;  %987 = vst [vmem:[#allocation2 + $0x8c] sm:$0xf] %v875_v24  ;;  %v3797_v36 = vld [vmem:[#allocation4 + $0x1d0] sm:$0xff]   ;;  %v3206_v38 = vrot.slane %v4380_v17, 9 }
  0x5d   : > { %3504 = vmatpush3.bf16.msra.mxu1 %v3786_v7  ;;  %942 = vst [vmem:[#allocation2 + $0xa4] sm:$0xf] %v875_v24  ;;  %v4396_v37 = vld [vmem:[%s4278_s19 + $0x34] sm:$0x1]  ;;  %v4400_v39 = vld [vmem:[%s4278_s19 + $0x38] sm:$0xf]  ;;  %v796_v41 = vor.u32 %v795_v35, %v792_v31 }
  0x5e   : > { %3505 = vmatprep.subr.bf16.mxu1 %v3793_v25  ;;  %v799_v42 = vshll.u32 %v4396_v37, 16  ;;  %v3800_v43 = vld [vmem:[#allocation4 + $0x190] sm:$0xff]   ;;  %701 = vst [vmem:[#allocation2 + $0xfc] sm:$0xf] %v4400_v39  ;;  %v804_v44 = vshrl.u32 %v4400_v39, 16  ;;  %v807_v45 = vshll.u32 %v4400_v39, 16 }
  0x5f   : > { %3466 = vmatpush3.bf16.msra.mxu0 %v3791_v22  ;;  %v813_v46 = vshll.u32 %v4403_v40, 16  ;;  %906 = vst [vmem:[#allocation2 + $0xe4] sm:$0xf] %v4400_v39  ;;  %951 = vst [vmem:[#allocation2 + $0xcc] sm:$0xf] %v4400_v39  ;;  %v797_v47 = vrot.slane %v796_v41, 4 }
  0x60   : > { %3467 = vmatprep.subr.bf16.mxu0 %v3795_v30  ;;  %v801_v48 = vrot.slane %v799_v42, 5  ;;  %v3787_v53 = vld [vmem:[#allocation2 + $0x90] ss:$36 sps:$4 sm:$0xff]   ;;  %v806_v56 = vrot.slane %v804_v44, 4  ;;  %v3789_v58 = vld [vmem:[#allocation2 + $0x9c] ss:$36 sps:$4 sm:$0xff]  }
  0x61   : > { %3506 = vmatpush3.bf16.msra.mxu1 %v3794_v28  ;;  %v3784_v51 = vld [vmem:[#allocation2 + $0x94] ss:$36 sps:$4 sm:$0xff]   ;;  %v809_v61 = vrot.slane %v807_v45, 5  ;;  %v815_v62 = vrot.slane %v813_v46, 5  ;;  %v3802_v63 = vld [vmem:[#allocation4 + $0x148] sm:$0xff]   ;;  %1912 = vmatprep.mubr.bf16.mxu1 %v3789_v58  ;;  %v878_v3 = vrot.slane %v4396_v37, 5  ;;  %v467_v58 = vunpack.c.l.bf16 %v4283_v33 }
  0x62   : > { %3507 = vmatprep.subr.bf16.mxu1 %v3797_v36  ;;  %v802_v60 = vsel %vm4301_vm5, %v797_v47, %v801_v48  ;;  %1847 = vmatprep.mubr.bf16.mxu0 %v3784_v51  ;;  %v4415_v0 = vld [vmem:[%s4278_s19 + $0x40] sm:$0xf]  ;;  %v3207_v6 = vrot.slane %v4400_v39, 9  ;;  %v882_v7 = vrot.slane %v4403_v40, 5  ;;  %v3805_v8 = vld [vmem:[#allocation4 + $0x108] sm:$0xff]   ;;  %v3816_v20 = vld [vmem:[#allocation4 + $0x238] sm:$0xff]  }
  0x63   : > { %3468 = vmatpush3.bf16.msra.mxu0 %v3796_v32  ;;  %v3792_v59 = vld [vmem:[#allocation2 + $0x98] ss:$36 sps:$4 sm:$0xff]   ;;  %831 = vst [vmem:[#allocation2 + $0xdc] sm:$0xf] %v802_v60  ;;  %928 = vst [vmem:[#allocation2 + $0xc4] sm:$0xf] %v802_v60  ;;  %v810_v1 = vor.u32 %v809_v61, %v806_v56  ;;  %v879_v10 = vsel %vm4295_vm4, %v3206_v38, %v878_v3  ;;  %v470_v3 = vunpack.c.l.bf16 %v4323_v2 }
  0x64   : > { %973 = vst [vmem:[#allocation2 + $0xac] sm:$0xf] %v802_v60  ;;  %1848 = vmatmul.mubr.bf16.gmra.mxu0 %v3787_v53  ;;  %907 = vst [vmem:[#allocation2 + $0x108] sm:$0xf] %v4415_v0  ;;  %1913 = vmatmul.mubr.bf16.gmra.mxu1 %v3792_v59  ;;  %v883_v11 = vsel %vm4295_vm4, %v3207_v6, %v882_v7  ;;  %v3807_v12 = vld [vmem:[#allocation4 + $0x1c8] sm:$0xff]   ;;  %v3809_v15 = vld [vmem:[#allocation4 + $0x140] sm:$0xff]  }
  0x65   : > { %3508 = vmatpush3.bf16.msra.mxu1 %v3800_v43  ;;  %952 = vst [vmem:[#allocation2 + $0xf0] sm:$0xf] %v4415_v0  ;;  %3469 = vmatprep.subr.bf16.mxu0 %v3802_v63  ;;  %v811_v9 = vrot.slane %v810_v1, 4  ;;  %898 = vst [vmem:[#allocation2 + $0xe0] sm:$0xf] %v879_v10  ;;  %v3808_v13 = vld [vmem:[#allocation4 + $0x188] sm:$0xff]   ;;  %v471_v63 = vunpack.c.l.bf16 %v4327_v4  ;;  %v469_v1 = vunpack.c.l.bf16 %v4306_v52  ;;  %v473_v4 = vunpack.c.l.bf16 %v4341_v26 }
  0x66   : > { %899 = vst [vmem:[#allocation2 + $0x104] sm:$0xf] %v883_v11  ;;  %943 = vst [vmem:[#allocation2 + $0xc8] sm:$0xf] %v879_v10  ;;  %3509 = vmatprep.subr.bf16.mxu1 %v3807_v12  ;;  %v3810_v16 = vld [vmem:[#allocation4 + $0x100] sm:$0xff]   ;;  %v909_v24 = vshrl.u32 %v4415_v0, 16  ;;  %v477_v26 = vunpack.c.l.bf16 %v4380_v17  ;;  %v481_v17 = vunpack.c.l.bf16 %v4415_v0 }
  0x67   : > { %3470 = vmatpush3.bf16.msra.mxu0 %v3805_v8  ;;  %944 = vst [vmem:[#allocation2 + $0xec] sm:$0xf] %v883_v11  ;;  %988 = vst [vmem:[#allocation2 + $0xb0] sm:$0xf] %v879_v10  ;;  %v816_v14 = vsel %vm4301_vm5, %v811_v9, %v815_v62  ;;  %v3811_v18 = vld [vmem:[#allocation4 + $0x1c0] sm:$0xff]   ;;  %v912_v28 = vshll.u32 %v4415_v0, 16  ;;  %v468_v62 = vunpack.c.l.bf16 %v4286_v34  ;;  %v472_v34 = vunpack.c.l.bf16 %v4330_v5 }
  0x68   : > { %989 = vst [vmem:[#allocation2 + $0xd4] sm:$0xf] %v883_v11  ;;  %832 = vst [vmem:[#allocation2 + $0x100] sm:$0xf] %v816_v14  ;;  %3471 = vmatprep.subr.bf16.mxu0 %v3809_v15  ;;  %v3815_v19 = vld [vmem:[#allocation4 + $0x180] sm:$0xff]   ;;  %v911_v30 = vrot.slane %v909_v24, 4  ;;  %v475_v15 = vunpack.c.l.bf16 %v4363_v55  ;;  %v476_v5 = vunpack.c.l.bf16 %v4366_v57  ;;  %v480_v57 = vunpack.c.l.bf16 %v4403_v40 }
  0x69   : > { %929 = vst [vmem:[#allocation2 + $0xe8] sm:$0xf] %v816_v14  ;;  %974 = vst [vmem:[#allocation2 + $0xd0] sm:$0xf] %v816_v14  ;;  %3510 = vmatpush3.bf16.msra.mxu1 %v3808_v13  ;;  %v3814_v22 = vld [vmem:[#allocation2 + $0x14] ss:$36 sps:$4 sm:$0xff]   ;;  %v474_v13 = vunpack.c.l.bf16 %v4360_v54 }
  0x6a   : > { %3511 = vmatprep.subr.bf16.mxu1 %v3811_v18  ;;  %v3801_v27 = vld [vmem:[#allocation2 + $0xd8] ss:$36 sps:$4 sm:$0xff]   ;;  %v914_v31 = vrot.slane %v912_v28, 5  ;;  %v3825_v35 = vld [vmem:[#allocation2 + $0x64] ss:$36 sps:$4 sm:$0xff]   ;;  %v3820_v42 = vld [vmem:[#allocation4 + $0x230] sm:$0xff]  }
  0x6b   : > { %3472 = vmatpush3.bf16.msra.mxu0 %v3810_v16  ;;  %v3803_v21 = vld [vmem:[#allocation2 + $0xe4] ss:$36 sps:$4 sm:$0xff]   ;;  %v3819_v29 = vld [vmem:[#allocation2 + $0x1c] ss:$36 sps:$4 sm:$0xff]   ;;  %v3812_v36 = vld [vmem:[#allocation2 + $0x10] ss:$36 sps:$4 sm:$0xff]  }
  0x6c   : > { %3576 = vmatprep.subr.bf16.mxu0 %v3816_v20  ;;  %1920 = vmatprep.mubr.bf16.mxu1 %v3803_v21  ;;  %v3817_v32 = vld [vmem:[#allocation2 + $0x18] ss:$36 sps:$4 sm:$0xff]   ;;  %v915_v41 = vor.u32 %v914_v31, %v911_v30  ;;  %v3208_v43 = vrot.slane %v4415_v0, 9  ;;  %v3824_v44 = vld [vmem:[#allocation4 + $0x228] sm:$0xff]   ;;  %v3827_v45 = vld [vmem:[#allocation2 + $0x60] ss:$36 sps:$4 sm:$0xff]   ;;  %v479_v21 = vunpack.c.l.bf16 %v4400_v39 }
  0x6d   : > { %3512 = vmatpush3.bf16.msra.mxu1 %v3815_v19  ;;  %v3806_v23 = vld [vmem:[#allocation2 + $0xe0] ss:$36 sps:$4 sm:$0xff]   ;;  %v3823_v48 = vld [vmem:[#allocation2 + $0x58] ss:$36 sps:$4 sm:$0xff]   ;;  %v465_v60 = vld [vmem:[%s4278_s19 + $0x48] sm:$0xf] }
  0x6e   : > { %1921 = vmatmul.mubr.bf16.gmra.mxu1 %v3806_v23  ;;  %v3821_v38 = vld [vmem:[#allocation2 + $0x5c] ss:$36 sps:$4 sm:$0xff]   ;;  %v4432_v46 = vld [vmem:[%s4278_s19 + $0x44] sm:$0x1]  ;;  %v916_v47 = vrot.slane %v915_v41, 4  ;;  %v955_v8 = vshrl.u32 %v465_v60, 16 }
  0x6f   : > { %v3798_v25 = vld [vmem:[#allocation2 + $0xdc] ss:$36 sps:$4 sm:$0xff]   ;;  %2026 = vmatprep.mubr.bf16.mxu1 %v3819_v29  ;;  %v918_v53 = vshll.u32 %v4432_v46, 16  ;;  %v935_v56 = vrot.slane %v4432_v46, 5  ;;  %v3829_v59 = vld [vmem:[#allocation2 + $0xa4] ss:$36 sps:$4 sm:$0xff]  }
  0x70   : > { %1855 = vmatprep.mubr.bf16.mxu0 %v3798_v25  ;;  %v3833_v51 = vld [vmem:[#allocation2 + $0xac] ss:$36 sps:$4 sm:$0xff]   ;;  %953 = vst [vmem:[#allocation2 + $0x114] sm:$0xf] %v465_v60  ;;  %v958_v9 = vshll.u32 %v465_v60, 16  ;;  %v3209_v10 = vrot.slane %v465_v60, 9 }
  0x71   : > { %1856 = vmatmul.mubr.bf16.gmra.mxu0 %v3801_v27  ;;  %v466_v61 = vld [vmem:[%s4278_s19 + $0x4c] sm:$0x1]  ;;  %v920_v6 = vrot.slane %v918_v53, 5  ;;  %v936_v7 = vsel %vm4295_vm4, %v3208_v43, %v935_v56  ;;  %v3828_v52 = vld [vmem:[#allocation4 + $0x220] sm:$0xff]   ;;  %v957_v11 = vrot.slane %v955_v8, 4  ;;  %v3836_v50 = vld [vmem:[#allocation4 + $0x210] sm:$0xff]   ;;  %s3023_s19 = scalar_lea.hbm %s5131_s10, %s3370_s30 }
  0x72   : > { %1961 = vmatprep.mubr.bf16.mxu0 %v3814_v22  ;;  %945 = vst [vmem:[#allocation2 + $0x110] sm:$0xf] %v936_v7  ;;  %990 = vst [vmem:[#allocation2 + $0xf8] sm:$0xf] %v936_v7  ;;  %v964_v33 = vshll.u32 %v466_v61, 16  ;;  %v960_v12 = vrot.slane %v958_v9, 5  ;;  %v482_v22 = vunpack.c.l.bf16 %v4432_v46 }
  0x73   : > { %v921_v2 = vsel %vm4301_vm5, %v916_v47, %v920_v6  ;;  %v981_v14 = vrot.slane %v466_v61, 5  ;;  %v3835_v16 = vld [vmem:[#allocation2 + $0xa8] ss:$36 sps:$4 sm:$0xff]   ;;  %v3191_v55 = vld [vmem:[%s5167_s1] ss:$0 sm:$0xff]  ;;  %vm2526_vm0 = vcmask 1046534  }
  0x74   : > { %930 = vst [vmem:[#allocation2 + $0x10c] sm:$0xf] %v921_v2  ;;  %975 = vst [vmem:[#allocation2 + $0xf4] sm:$0xf] %v921_v2  ;;  %v961_v18 = vor.u32 %v960_v12, %v957_v11  ;;  %v966_v19 = vrot.slane %v964_v33, 5  ;;  %v4463_v39 = vmul.f32 %v3191_v55, %v467_v58  ;;  %v4465_v25 = vmul.f32 %v3191_v55, %v468_v62  ;;  %v3840_v61 = vld [vmem:[#allocation4 + $0x208] sm:$0xff]  }
  0x75   : > { %v982_v54 = vsel %vm4295_vm4, %v3209_v10, %v981_v14  ;;  %v3831_v23 = vld [vmem:[#allocation2 + $0xa0] ss:$36 sps:$4 sm:$0xff]   ;;  %v4467_v49 = vmul.f32 %v3191_v55, %v471_v63  ;;  %v4469_v27 = vmul.f32 %v3191_v55, %v472_v34  ;;  %v4471_v28 = vmul.f32 %v3191_v55, %v469_v1 }
  0x76   : > { %2027 = vmatmul.mubr.bf16.vlgmr.msra.gmra.mxu1 %v3817_v32  ;;  %v962_v24 = vrot.slane %v961_v18, 4  ;;  %991 = vst [vmem:[#allocation2 + $0x11c] sm:$0xf] %v982_v54  ;;  %5168 = vst [vmem:[#allocation14_spill] sm:$0xff] %v4463_v39  ;;  %v4473_v40 = vmul.f32 %v3191_v55, %v470_v3  ;;  %v4475_v0 = vmul.f32 %v3191_v55, %v473_v4  ;;  %v590_v30 = vrot.slane %v4463_v39, 1  ;;  %v3844_v2 = vld [vmem:[#allocation4 + $0x200] sm:$0xff]  }
  0x77   : > { %2034 = vmatprep.mubr.bf16.mxu1 %v3825_v35  ;;  %5169 = vst [vmem:[#allocation15_spill] sm:$0xff] %v4465_v25  ;;  %5170 = vst [vmem:[#allocation16_spill] sm:$0xff] %v4467_v49  ;;  %v591_v31 = vrot.slane %v4465_v25, 1  ;;  %v596_v32 = vrot.slane %v4467_v49, 1  ;;  %v597_v35 = vrot.slane %v4469_v27, 1  ;;  %v4485_v41 = vmul.f32 %v3191_v55, %v474_v13 }
  0x78   : > { %5171 = vst [vmem:[#allocation17_spill] sm:$0xff] %v4469_v27  ;;  %5172 = vst [vmem:[#allocation18_spill] sm:$0xff] %v4471_v28  ;;  %v967_v29 = vsel %vm4301_vm5, %v962_v24, %v966_v19  ;;  %v4491_v46 = vmul.f32 %v3191_v55, %v476_v5  ;;  %v4496_v53 = vmul.f32 %v3191_v55, %v477_v26  ;;  %v3845_v33 = vld [vmem:[#allocation2 + $0x20] ss:$36 sps:$4 sm:$0xff]   ;;  %v3846_v5 = vld [vmem:[#allocation2 + $0x68] ss:$36 sps:$4 sm:$0xff]  }
  0x79   : > { %1962 = vmatmul.mubr.bf16.vlgmr.msra.gmra.mxu0 %v3812_v36  ;;  %5173 = vst [vmem:[#allocation19_spill] sm:$0xff] %v4473_v40  ;;  %5174 = vst [vmem:[#allocation20_spill] sm:$0xff] %v4475_v0  ;;  %v593_v36 = vrot.slane %v4471_v28, 1  ;;  %v592_v43 = vsel %vm589_vm6, %v590_v30, %v591_v31  ;;  %v598_v47 = vsel %vm589_vm6, %v596_v32, %v597_v35  ;;  %v3847_v26 = vld [vmem:[#allocation2 + $0xb0] ss:$36 sps:$4 sm:$0xff]   ;;  %vm2528_vm1 = vcmask 1047559  }
  0x7a   : > { %3577 = vmatpush3.bf16.msra.mxu0 %v3816_v20  ;;  %1969 = vmatprep.mubr.bf16.mxu0 %v3821_v38  ;;  %v478_v20 = vunpack.c.l.bf16 %v4396_v37  ;;  %v3832_v37 = vld [vmem:[#allocation4 + $0x218] sm:$0xff]   ;;  %976 = vst [vmem:[#allocation2 + $0x118] sm:$0xf] %v967_v29  ;;  %v594_v38 = vrot.slane %v4473_v40, 1  ;;  %5175 = vst [vmem:[#allocation21_spill] sm:$0xff] %v4485_v41  ;;  %v603_v58 = vrot.slane %v4491_v46, 1  ;;  %v4502_v60 = vmul.f32 %v3191_v55, %v479_v21 }
  0x7b   : > { %3578 = vmatprep.subr.bf16.mxu0 %v3820_v42  ;;  %5177 = vst [vmem:[#allocation23_spill] sm:$0xff] %v4491_v46  ;;  %622 = vadd.xlane.f32.xlu0 %v592_v43  ;;  %5178 = vst [vmem:[#allocation24_spill] sm:$0xff] %v4496_v53  ;;  %v605_v63 = vrot.slane %v4496_v53, 1  ;;  %v4506_v1 = vmul.f32 %v3191_v55, %v480_v57  ;;  %v4508_v3 = vmul.f32 %v3191_v55, %v481_v17  ;;  %v3839_v6 = vld [vmem:[#allocation2 + $0xe8] ss:$36 sps:$4 sm:$0xff]   ;;  %vm3000_vm4 = vcmask 57344  }
  0x7c   : > { %626 = vadd.xlane.f32.xlu1 %v598_v47  ;;  %5180 = vst [vmem:[#allocation26_spill] sm:$0xff] %v4502_v60  ;;  %v608_v8 = vrot.slane %v4502_v60, 1  ;;  %v4512_v9 = vmul.f32 %v3191_v55, %v482_v22  ;;  %vm2531_vm5 = vcmask 64512  }
  0x7d   : > { %5181 = vst [vmem:[#allocation27_spill] sm:$0xff] %v4506_v1  ;;  %5182 = vst [vmem:[#allocation28_spill] sm:$0xff] %v4508_v3  ;;  %v609_v10 = vrot.slane %v4506_v1, 1  ;;  %v611_v34 = vrot.slane %v4508_v3, 1 }
  0x7e   : > { %3579 = vmatpush3.bf16.msra.mxu0 %v3820_v42  ;;  %2035 = vmatmul.mubr.bf16.gmra.mxu1 %v3827_v45  ;;  %v3837_v42 = vld [vmem:[#allocation2 + $0xec] ss:$36 sps:$4 sm:$0xff]   ;;  %v4489_v45 = vmul.f32 %v3191_v55, %v475_v15  ;;  %5183 = vst [vmem:[#allocation29_spill] sm:$0xff] %v4512_v9  ;;  %v612_v12 = vrot.slane %v4512_v9, 1 }
  0x7f   : > { %3580 = vmatprep.subr.bf16.mxu0 %v3824_v44  ;;  %2042 = vmatprep.mubr.bf16.mxu1 %v3833_v51  ;;  %v600_v51 = vrot.slane %v4485_v41, 1  ;;  %v610_v14 = vsel %vm589_vm6, %v608_v8, %v609_v10 }
  0x80   : > { %5176 = vst [vmem:[#allocation22_spill] sm:$0xff] %v4489_v45  ;;  %v602_v56 = vrot.slane %v4489_v45, 1  ;;  %v613_v15 = vsel %vm589_vm6, %v611_v34, %v612_v12 }
  0x81   : > { %1970 = vmatmul.mubr.bf16.gmra.mxu0 %v3823_v48  ;;  %v595_v48 = vsel %vm589_vm6, %v593_v36, %v594_v38  ;;  %v3841_v4 = vld [vmem:[#allocation2 + $0xf4] ss:$36 sps:$4 sm:$0xff]  }
  0x82   : > { %3581 = vmatpush3.bf16.msra.mxu0 %v3824_v44  ;;  %1977 = vmatprep.mubr.bf16.mxu0 %v3829_v59  ;;  %v599_v44 = vrot.slane %v4475_v0, 1  ;;  %v4500_v59 = vmul.f32 %v3191_v55, %v478_v20  ;;  %v604_v11 = vsel %vm589_vm6, %v602_v56, %v603_v58  ;;  %v4569_v58 = vstv %s446_s22  ;;  %s4005_s22 = scalar_lea.vmem %s3026_s20, 128 }
  0x83   : > { %3582 = vmatprep.subr.bf16.mxu0 %v3828_v52  ;;  %624 = vadd.xlane.f32.xlu0 %v595_v48  ;;  %5184 = vst [vmem:[#allocation30_spill] sm:$0xff] %v4569_v58  ;;  %p4006_p8 = scmp.ne.s32.totalorder %s3026_s20, %s4005_s22 }
  0x84   : > { %5179 = vst [vmem:[#allocation25_spill] sm:$0xff] %v4500_v59  ;;  %v601_v62 = vsel %vm589_vm6, %v599_v44, %v600_v51  ;;  %v606_v7 = vrot.slane %v4500_v59, 1 }
  0x85   : > { %628 = vadd.xlane.f32.xlu1 %v601_v62  ;;  %p4007_p9 = pnand %p4006_p8, %p4245_p5 }
  0x86   : > { %3583 = vmatpush3.bf16.msra.mxu0 %v3828_v52  ;;  %2043 = vmatmul.mubr.bf16.gmra.mxu1 %v3835_v16  ;;  %v3843_v52 = vld [vmem:[#allocation2 + $0xf0] ss:$36 sps:$4 sm:$0xff]   ;;  %v607_v13 = vsel %vm589_vm6, %v605_v63, %v606_v7  ;;  %v3848_v16 = vld [vmem:[#allocation2 + $0xf8] ss:$36 sps:$4 sm:$0xff]   ;;  %vm2349_vm6 = vcmask 253952  }
  0x87   : > { %3584 = vmatprep.subr.bf16.mxu0 %v3832_v37  ;;  %2050 = vmatprep.mubr.bf16.mxu1 %v3841_v4  ;;  %p4008_p10 = pneg %p4007_p9 }
  0x88   : > { %630 = vadd.xlane.f32.xlu0 %v604_v11 }
  0x89   : > { %1978 = vmatmul.mubr.bf16.gmra.mxu0 %v3831_v23  ;;  %632 = vadd.xlane.f32.xlu1 %v607_v13 }
  0x8a   : > { %3585 = vmatpush3.bf16.msra.mxu0 %v3832_v37  ;;  %1985 = vmatprep.mubr.bf16.mxu0 %v3837_v42 }
  0x8b   : > { %3586 = vmatprep.subr.bf16.mxu0 %v3836_v50 }
  0x8c   : > { %634 = vadd.xlane.f32.xlu0 %v610_v14 }
  0x8d   : > { %636 = vadd.xlane.f32.xlu1 %v613_v15 }
  0x8e   : > { %3587 = vmatpush3.bf16.msra.mxu0 %v3836_v50  ;;  %2051 = vmatmul.mubr.bf16.gmra.mxu1 %v3843_v52 }
  0x8f   : > { %3588 = vmatprep.subr.bf16.mxu0 %v3840_v61 }
  0x91   : > { %1986 = vmatmul.mubr.bf16.gmra.mxu0 %v3839_v6 }
  0x92   : > { %3589 = vmatpush3.bf16.msra.mxu0 %v3840_v61  ;;  %3592 = vmatprep.mubr.bf16.mxu0 %v3845_v33 }
  0x93   : > { %3590 = vmatprep.subr.bf16.mxu0 %v3844_v2 }
  0x96   : > { %3591 = vmatpush3.bf16.msra.mxu0 %v3844_v2 }
  0x99   : > { %3593 = vmatmul.mubr.bf16.vlgmr.msra.gmra.mxu0 %v3846_v5 }
  0x9a   : > { %3596 = vmatprep.mubr.bf16.mxu0 %v3847_v26 }
  0xa1   : > { %3597 = vmatmul.mubr.bf16.gmra.mxu0 %v3848_v16 }
 0x104   : > { %v623_v42 = vpop.xlane.xlu0 %622 }
 0x105   : > { %v627_v44 = vpop.xlane.xlu1 %626  ;;  %v638_v8 = vadd.f32 %v623_v42, %v4569_v58 }
 0x106   : > { %v640_v63 = vadd.f32 %v627_v44, %v4569_v58 }
 0x107   : > { %v3192_v13 = vmul.f32 -1.442695, %v638_v8 }
 0x108   : > { %v3194_v4 = vmul.f32 -1.442695, %v640_v63 }
 0x10a   : > { %3865 = vpow2.f32 %v3194_v4 }
 0x10b   : > { %3867 = vpow2.f32 %v3192_v13 }
 0x10c   : > { %v625_v51 = vpop.xlane.xlu0 %624 }
 0x10d   : > { %v639_v14 = vadd.f32 %v625_v51, %v4569_v58 }
 0x10e   : > { %v4523_v19 = vpop.f32.mrf.mxu0  ;;  %v629_v61 = vpop.xlane.xlu1 %628 }
 0x10f   : > { %v641_v52 = vadd.f32 %v629_v61, %v4569_v58  ;;  %v3193_v63 = vmul.f32 -1.442695, %v639_v14 }
 0x110   : > { %v4521_v18 = vpop.f32.mrf.mxu1  ;;  %v4527_v21 = vpop.f32.mrf.mxu0 }
 0x111   : > { %v631_v33 = vpop.xlane.xlu0 %630  ;;  %v3195_v26 = vmul.f32 -1.442695, %v641_v52 }
 0x112   : > { %v4525_v20 = vpop.f32.mrf.mxu1  ;;  %v4529_v54 = vpop.f32.mrf.mxu0  ;;  %v642_v44 = vadd.f32 %v631_v33, %v4569_v58 }
 0x113   : > { %v633_v2 = vpop.xlane.xlu1 %632  ;;  %3869 = vpow2.f32 %v3195_v26  ;;  %v3435_v39 = vadd.f32 %v4525_v20, %v4521_v18 }
 0x114   : > { %v4531_v55 = vpop.f32.mrf.mxu1  ;;  %v4533_v57 = vpop.f32.mrf.mxu0  ;;  %v3196_v1 = vmul.f32 -1.442695, %v642_v44  ;;  %v643_v52 = vadd.f32 %v633_v2, %v4569_v58  ;;  %3871 = vpow2.f32 %v3193_v63 }
 0x115   : > { %v635_v16 = vpop.xlane.xlu0 %634 }
 0x116   : > { %v4535_v17 = vpop.f32.mrf.mxu1  ;;  %v4537_v22 = vpop.f32.mrf.mxu0  ;;  %v644_v51 = vadd.f32 %v635_v16, %v4569_v58  ;;  %3873 = vpow2.f32 %v3196_v1  ;;  %v3197_v53 = vmul.f32 -1.442695, %v643_v52  ;;  %v3395_v52 = vadd.f32 %v4527_v21, %v4523_v19 }
 0x117   : > { %v637_v9 = vpop.xlane.xlu1 %636  ;;  %v3866_v2 = vpop.eup %3865  ;;  %v3438_v18 = vadd.f32 %v4535_v17, %v4531_v55 }
 0x118   : > { %v4539_v23 = vpop.f32.mrf.mxu1  ;;  %v4541_v37 = vpop.f32.mrf.mxu0  ;;  %v645_v33 = vadd.f32 %v637_v9, %v4569_v58  ;;  %v3198_v59 = vmul.f32 -1.442695, %v644_v51  ;;  %v672_v1 = vadd.f32 1.0, %v3866_v2  ;;  %v3398_v2 = vadd.f32 %v4533_v57, %v4529_v54 }
 0x119   : > { %v3868_v9 = vpop.eup %3867 }
 0x11a   : > { %v4543_v24 = vpop.f32.mrf.mxu1  ;;  %v4545_v29 = vpop.f32.mrf.mxu0  ;;  %v3199_v16 = vmul.f32 -1.442695, %v645_v33  ;;  %3875 = vpow2.f32 %v3198_v59  ;;  %v3401_v59 = vadd.f32 %v4541_v37, %v4537_v22 }
 0x11b   : > { %3877 = vpow2.f32 %v3197_v53  ;;  %v4630_v53 = vld [vmem:[%s5185_s4] ss:$0 sm:$0xff] }
 0x11c   : > { %v4547_v30 = vpop.f32.mrf.mxu1  ;;  %v4549_v31 = vpop.f32.mrf.mxu0  ;;  %3879 = vpow2.f32 %v3199_v16  ;;  %v670_v16 = vadd.f32 1.0, %v3868_v9  ;;  %v1834_v25 = vadd.f32 %v3395_v52, %v4630_v53  ;;  %v1842_v57 = vadd.f32 %v3401_v59, %v4630_v53 }
 0x11d   : > { %v3404_v19 = vadd.f32 %v4549_v31, %v4545_v29  ;;  %3881 = vrcp.f32 %v672_v1  ;;  %v3441_v29 = vadd.f32 %v4543_v24, %v4539_v23  ;;  %v1837_v1 = vadd.f32 %v3398_v2, %v4630_v53 }
 0x11e   : > { %v4551_v32 = vpop.f32.mrf.mxu1  ;;  %3883 = vrcp.f32 %v670_v16  ;;  %v1899_v2 = vadd.f32 %v3435_v39, %v1834_v25 }
 0x11f   : > { %v1845_v20 = vadd.f32 %v3404_v19, %v4630_v53  ;;  %v1907_v55 = vadd.f32 %v3441_v29, %v1842_v57  ;;  %v1902_v19 = vadd.f32 %v3438_v18, %v1837_v1 }
 0x120   : > { %v3870_v51 = vpop.eup %3869 }
 0x121   : > { %v3872_v49 = vpop.eup %3871  ;;  %v673_v28 = vadd.f32 1.0, %v3870_v51 }
 0x122   : > { %v671_v31 = vadd.f32 1.0, %v3872_v49 }
 0x123   : > { %v3874_v54 = vpop.eup %3873  ;;  %3885 = vrcp.f32 %v673_v28 }
 0x124   : > { %v4553_v35 = vpop.f32.mrf.mxu0  ;;  %v4555_v36 = vpop.f32.mrf.mxu1  ;;  %v674_v24 = vadd.f32 1.0, %v3874_v54  ;;  %3887 = vrcp.f32 %v671_v31 }
 0x126   : > { %v4557_v38 = vpop.f32.mrf.mxu0  ;;  %v4559_v50 = vpop.f32.mrf.mxu1  ;;  %3889 = vrcp.f32 %v674_v24 }
 0x127   : > { %v3407_v22 = vadd.f32 %v4557_v38, %v4553_v35  ;;  %v3444_v35 = vadd.f32 %v4551_v32, %v4547_v30  ;;  %v3876_v52 = vpop.eup %3875  ;;  %v3447_v49 = vadd.f32 %v4559_v50, %v4555_v36 }
 0x128   : > { %v4561_v43 = vpop.f32.mrf.mxu1  ;;  %v4563_v47 = vpop.f32.mrf.mxu0  ;;  %v676_v50 = vadd.f32 1.0, %v3876_v52 }
 0x129   : > { %v1850_v23 = vadd.f32 %v3407_v22, %v4630_v53  ;;  %v3878_v16 = vpop.eup %3877  ;;  %v1910_v28 = vadd.f32 %v3444_v35, %v1845_v20 }
 0x12a   : > { %v4565_v48 = vpop.f32.mrf.mxu1  ;;  %v4567_v56 = vpop.f32.mrf.mxu0  ;;  %3891 = vrcp.f32 %v676_v50 }
 0x12b   : > { %v3880_v32 = vpop.eup %3879  ;;  %v1915_v54 = vadd.f32 %v3447_v49, %v1850_v23 }
 0x12e   : > { %v4571_v62 = vpop.f32.mrf.mxu1 }
 0x130   : > { %v4576_v7 = vpop.f32.mrf.mxu1 }
 0x131   : > { %v4574_v6 = vpop.f32.mrf.mxu0 }
 0x132   : > { %v4581_v34 = vpop.f32.mrf.mxu1 }
 0x133   : > { %v4579_v10 = vpop.f32.mrf.mxu0 }
 0x134   : > { %v4586_v12 = vpop.f32.mrf.mxu1 }
 0x135   : > { %v4584_v11 = vpop.f32.mrf.mxu0 }
 0x136   : > { %v4591_v5 = vpop.f32.mrf.mxu1 }
 0x137   : > { %v4589_v15 = vpop.f32.mrf.mxu0 }
 0x138   : > { %v4596_v61 = vpop.f32.mrf.mxu1 }
 0x139   : > { %v4593_v42 = vpop.f32.mrf.mxu0 }
 0x13a   : > { %v4600_v8 = vpop.f32.mrf.mxu1 }
 0x13b   : > { %v4598_v3 = vpop.f32.mrf.mxu0 }
 0x13c   : > { %v4606_v60 = vpop.f32.mrf.mxu1  ;;  %v3475_v17 = vadd.f32 %v4598_v3, %v4593_v42  ;;  %v3410_v3 = vadd.f32 %v4567_v56, %v4563_v47  ;;  %v675_v42 = vadd.f32 1.0, %v3878_v16 }
 0x13d   : > { %v4603_v4 = vpop.f32.mrf.mxu0  ;;  %v3518_v47 = vadd.f32 %v4606_v60, %v4600_v8 }
 0x13e   : > { %v4611_v14 = vpop.f32.mrf.mxu1  ;;  %3893 = vrcp.f32 %v675_v42  ;;  %v1853_v1 = vadd.f32 %v3410_v3, %v4630_v53 }
 0x13f   : > { %v4609_v13 = vpop.f32.mrf.mxu0 }
 0x140   : > { %v4613_v46 = vpop.f32.mrf.mxu1 }
 0x141   : > { %v3479_v26 = vpop.f32.mrf.mxu0  ;;  %v3521_v39 = vadd.f32 %v4613_v46, %v4611_v14  ;;  %v3416_v46 = vadd.f32 %v4589_v15, %v4584_v11 }
 0x142   : > { %v4615_v45 = vpop.f32.mrf.mxu1 }
 0x143   : > { %v3480_v44 = vpop.f32.mrf.mxu0 }
 0x144   : > { %v4617_v41 = vpop.f32.mrf.mxu1  ;;  %v3481_v51 = vadd.f32 %v3480_v44, %v3479_v26  ;;  %v3413_v26 = vadd.f32 %v4579_v10, %v4574_v6  ;;  %v3478_v44 = vadd.f32 %v4609_v13, %v4603_v4  ;;  %v3453_v6 = vadd.f32 %v4576_v7, %v4571_v62 }
 0x145   : > { %v3482_v63 = vpop.f32.mrf.mxu0  ;;  %v1964_v10 = vadd.f32 %v3475_v17, %v1899_v2  ;;  %v3515_v4 = vadd.f32 %v4596_v61, %v4591_v5  ;;  %v677_v13 = vadd.f32 1.0, %v3880_v32  ;;  %v3524_v62 = vadd.f32 %v4617_v41, %v4615_v45 }
 0x146   : > { %v4619_v0 = vpop.f32.mrf.mxu1  ;;  %v1972_v22 = vadd.f32 %v3481_v51, %v1907_v55  ;;  %v1858_v31 = vadd.f32 %v3413_v26, %v4630_v53  ;;  %v3450_v5 = vadd.f32 %v4565_v48, %v4561_v43  ;;  %v1861_v41 = vadd.f32 %v3416_v46, %v4630_v53 }
 0x147   : > { %v3483_v58 = vpop.f32.mrf.mxu0  ;;  %3895 = vrcp.f32 %v677_v13  ;;  %v2029_v18 = vadd.f32 %v3515_v4, %v1964_v10  ;;  %v3456_v45 = vadd.f32 %v4586_v12, %v4581_v34 }
 0x148   : > { %v4625_v27 = vpop.f32.mrf.mxu1  ;;  %v3484_v25 = vadd.f32 %v3483_v58, %v3482_v63  ;;  %v1967_v58 = vadd.f32 %v3478_v44, %v1902_v19  ;;  %v2037_v7 = vadd.f32 %v3521_v39, %v1972_v22  ;;  %v3882_v63 = vpop.eup %3881  ;;  %v1923_v35 = vadd.f32 %v3453_v6, %v1858_v31 }
 0x149   : > { %v4623_v33 = vpop.f32.mrf.mxu0  ;;  %v3884_v20 = vpop.eup %3883 }
 0x14a   : > { %v4640_v40 = vpop.f32.mrf.mxu1  ;;  %v1975_v14 = vadd.f32 %v3484_v25, %v1910_v28  ;;  %v2032_v48 = vadd.f32 %v3518_v47, %v1967_v58  ;;  %v3886_v49 = vpop.eup %3885  ;;  %v1926_v28 = vadd.f32 %v3456_v45, %v1861_v41  ;;  %v5189_v41 = vld [vmem:[#allocation19_spill] sm:$0xff] }
 0x14b   : > { %v4638_v21 = vpop.f32.mrf.mxu0  ;;  %v517_v45 = vsel %vm510_vm8, %v5189_v41, 0.0 }
 0x14c   : > { %v4652_v9 = vpop.f32.mrf.mxu1  ;;  %v3487_v61 = vadd.f32 %v4638_v21, %v4623_v33  ;;  %v3319_v33 = vld [vmem:[%s5126_s5] ss:$0 sm:$0xff]  ;;  %v3527_v21 = vadd.f32 %v4625_v27, %v4619_v0  ;;  %v2040_v23 = vadd.f32 %v3524_v62, %v1975_v14  ;;  %v3888_v27 = vpop.eup %3887  ;;  %v1918_v0 = vadd.f32 %v3450_v5, %v1853_v1 }
 0x14d   : > { %v4647_v37 = vpop.f32.mrf.mxu0  ;;  %v3530_v26 = vadd.f32 %v4652_v9, %v4640_v40  ;;  %v3890_v39 = vpop.eup %3889 }
 0x14e   : > { %v3531_v30 = vpop.f32.mrf.mxu1  ;;  %v1980_v24 = vadd.f32 %v3487_v61, %v1915_v54  ;;  %v3892_v9 = vpop.eup %3891 }
 0x14f   : > { %v4660_v38 = vpop.f32.mrf.mxu0  ;;  %v3894_v4 = vpop.eup %3893 }
 0x150   : > { %v3532_v29 = vpop.f32.mrf.mxu1  ;;  %v3490_v53 = vadd.f32 %v4660_v38, %v4647_v37  ;;  %v2045_v22 = vadd.f32 %v3527_v21, %v1980_v24 }
 0x151   : > { %v3491_v59 = vpop.f32.mrf.mxu0  ;;  %v3533_v34 = vadd.f32 %v3532_v29, %v3531_v30 }
 0x152   : > { %v3534_v60 = vpop.f32.mrf.mxu1  ;;  %v1983_v38 = vadd.f32 %v3490_v53, %v1918_v0  ;;  %v5194_v53 = vld [vmem:[#allocation22_spill] sm:$0xff] }
 0x153   : > { %v3492_v36 = vpop.f32.mrf.mxu0 }
 0x154   : > { %v3493_v11 = vadd.f32 %v3492_v36, %v3491_v59  ;;  %v3535_v2 = vpop.f32.mrf.mxu1  ;;  %v2048_v31 = vadd.f32 %v3530_v26, %v1983_v38  ;;  %v3896_v58 = vpop.eup %3895  ;;  %v5200_v26 = vld [vmem:[#allocation28_spill] sm:$0xff]  ;;  %v5201_v38 = vld [vmem:[#allocation29_spill] sm:$0xff] }
 0x155   : > { %v3494_v57 = vpop.f32.mrf.mxu0  ;;  %v3536_v30 = vadd.f32 %v3535_v2, %v3534_v60 }
 0x156   : > { %v1988_v59 = vadd.f32 %v3493_v11, %v1923_v35 }
 0x157   : > { %v3495_v56 = vpop.f32.mrf.mxu0 }
 0x158   : > { %v3496_v16 = vadd.f32 %v3495_v56, %v3494_v57  ;;  %v2053_v36 = vadd.f32 %v3533_v34, %v1988_v59  ;;  %v532_v59 = vsel %vm506_vm7, %v5194_v53, 0.0  ;;  %v5195_v34 = vld [vmem:[#allocation23_spill] sm:$0xff] }
 0x159   : > { %v3594_v15 = vpop.f32.mrf.mxu0 }
 0x15a   : > { %v2102_v8 = vadd.f32 %v3594_v15, %v2037_v7  ;;  %v1991_v25 = vadd.f32 %v3496_v16, %v1926_v28  ;;  %v5186_v15 = vld [vmem:[#allocation14_spill] sm:$0xff]  ;;  %v5196_v16 = vld [vmem:[#allocation24_spill] sm:$0xff] }
 0x15b   : > { %v2093_v43 = vpop.f32.mrf.mxu0  ;;  %v507_v1 = vsel %vm506_vm7, %v5186_v15, 0.0  ;;  %v538_v2 = vsel %vm506_vm7, %v5196_v16, 0.0 }
 0x15c   : > { %v4699_v51 = vmul.f32 %v3882_v63, %v2102_v8  ;;  %v2094_v52 = vadd.f32 %v2093_v43, %v2029_v18  ;;  %v2056_v29 = vadd.f32 %v3536_v30, %v1991_v25  ;;  %v5187_v8 = vld [vmem:[#allocation15_spill] sm:$0xff]  ;;  %v5190_v43 = vld [vmem:[#allocation16_spill] sm:$0xff]  ;;  %v553_v30 = vsel %vm510_vm8, %v5201_v38, 0.0 }
 0x15d   : > { %v3595_v12 = vpop.f32.mrf.mxu0  ;;  %v511_v18 = vsel %vm510_vm8, %v5187_v8, 0.0  ;;  %v3852_v25 = vld [vmem:[%s5127_s6 + $0x20] sm:$0xff]  }
 0x15e   : > { %v4703_v55 = vmul.f32 %v3884_v20, %v2094_v52  ;;  %v2105_v17 = vadd.f32 %v3595_v12, %v2040_v23  ;;  %v2141_v32 = vmul.f32 %v3319_v33, %v4699_v51  ;;  %v5188_v20 = vld [vmem:[#allocation18_spill] sm:$0xff]  ;;  %v5192_v52 = vld [vmem:[#allocation20_spill] sm:$0xff]  ;;  %v535_v12 = vsel %vm510_vm8, %v5195_v34, 0.0 }
 0x15f   : > { %v2096_v19 = vpop.f32.mrf.mxu0  ;;  %v514_v35 = vsel %vm506_vm7, %v5188_v20, 0.0  ;;  %v526_v23 = vsel %vm506_vm7, %v5192_v52, 0.0 }
 0x160   : > { %v4708_v44 = vmul.f32 %v3886_v49, %v2105_v17  ;;  %v2097_v37 = vadd.f32 %v2096_v19, %v2032_v48  ;;  %2151 = vadd.xlane.f32.xlu0 %v2141_v32  ;;  %v2139_v42 = vmul.f32 %v3319_v33, %v4703_v55  ;;  %v520_v48 = vsel %vm506_vm7, %v5190_v43, 0.0  ;;  %v5193_v49 = vld [vmem:[#allocation21_spill] sm:$0xff]  ;;  %v5199_v19 = vld [vmem:[#allocation27_spill] sm:$0xff] }
 0x161   : > { %v3598_v50 = vpop.f32.mrf.mxu0  ;;  %v529_v24 = vsel %vm510_vm8, %v5193_v49, 0.0  ;;  %v5197_v17 = vld [vmem:[#allocation25_spill] sm:$0xff]  ;;  %v547_v28 = vsel %vm510_vm8, %v5199_v19, 0.0 }
 0x162   : > { %v4710_v54 = vmul.f32 %v3888_v27, %v2097_v37  ;;  %v2142_v3 = vmul.f32 %v3319_v33, %v4708_v44  ;;  %v2118_v6 = vadd.f32 %v3598_v50, %v2053_v36  ;;  %v541_v32 = vsel %vm510_vm8, %v5197_v17, 0.0  ;;  %v5198_v27 = vld [vmem:[#allocation26_spill] sm:$0xff] }
 0x163   : > { %v2109_v57 = vpop.f32.mrf.mxu0  ;;  %v544_v0 = vsel %vm506_vm7, %v5198_v27, 0.0  ;;  %v550_v37 = vsel %vm506_vm7, %v5200_v26, 0.0  ;;  %v3849_v36 = vld [vmem:[%s5127_s6 + $0x38] sm:$0xff]   ;;  %v4130_v50 = vmov 0.0  }
 0x164   : > { %v2110_v40 = vadd.f32 %v2109_v57, %v2045_v22  ;;  %2153 = vadd.xlane.f32.xlu1 %v2142_v3  ;;  %2147 = vadd.xlane.f32.xlu0 %v2139_v42  ;;  %v2140_v46 = vmul.f32 %v3319_v33, %v4710_v54  ;;  %v4717_v56 = vmul.f32 %v3892_v9, %v2118_v6  ;;  %v3850_v22 = vld [vmem:[%s5127_s6 + $0x30] sm:$0xff]   ;;  %v3853_v3 = vld [vmem:[%s5127_s6 + $0x18] sm:$0xff]   ;;  %v3855_v57 = vld [vmem:[%s5127_s6 + $0x8] sm:$0xff]  }
 0x165   : > { %v3599_v10 = vpop.f32.mrf.mxu0  ;;  %3600 = vmatprep.subr.bf16.mxu1 %v4130_v50  ;;  %3616 = vmatprep.mubr.msk.bf16.mxu1 %vm4131_vm9, %v4130_v50  ;;  %v3854_v42 = vld [vmem:[%s5127_s6 + $0x10] sm:$0xff]   ;;  %v3856_v6 = vld [vmem:[%s5127_s6] sm:$0xff]  }
 0x166   : > { %v4714_v13 = vmul.f32 %v3890_v39, %v2110_v40  ;;  %v2121_v14 = vadd.f32 %v3599_v10, %v2056_v29  ;;  %v2145_v11 = vmul.f32 %v3319_v33, %v4717_v56  ;;  %3601 = vmatpush3.bf16.msra.mxu1 %v3849_v36  ;;  %v3851_v39 = vld [vmem:[%s5127_s6 + $0x28] sm:$0xff]  }
 0x167   : > { %v2112_v47 = vpop.f32.mrf.mxu0  ;;  %3602 = vmatprep.subr.bf16.mxu1 %v4130_v50 }
 0x168   : > { %v2113_v62 = vadd.f32 %v2112_v47, %v2048_v31  ;;  %2149 = vadd.xlane.f32.xlu1 %v2140_v46  ;;  %v2143_v7 = vmul.f32 %v3319_v33, %v4714_v13  ;;  %v4722_v5 = vmul.f32 %v3896_v58, %v2121_v14  ;;  %v2439_v58 = vlaneseq }
 0x16a   : > { %v4720_v63 = vmul.f32 %v3894_v4, %v2113_v62  ;;  %2155 = vadd.xlane.f32.xlu0 %v2143_v7  ;;  %v2146_v60 = vmul.f32 %v3319_v33, %v4722_v5  ;;  %3603 = vmatpush3.bf16.msra.mxu1 %v3850_v22  ;;  %v2440_v62 = vand.u32 127, %v2439_v58  ;;  %v2443_v20 = vshrl.u32 %v2439_v58, 7 }
 0x16b   : > { %3604 = vmatprep.subr.bf16.mxu1 %v4130_v50 }
 0x16c   : > { %v2144_v61 = vmul.f32 %v3319_v33, %v4720_v63  ;;  %v5191_v33 = vld [vmem:[#allocation17_spill] sm:$0xff] }
 0x16d   : > { %v523_v21 = vsel %vm510_vm8, %v5191_v33, 0.0 }
 0x16e   : > { %2157 = vadd.xlane.f32.xlu1 %v2144_v61  ;;  %2159 = vadd.xlane.f32.xlu0 %v2145_v11 }
 0x16f   : > { %3605 = vmatpush3.bf16.msra.mxu1 %v3851_v39 }
 0x170   : > { %3606 = vmatprep.subr.bf16.mxu1 %v4130_v50 }
 0x172   : > { %2161 = vadd.xlane.f32.xlu1 %v2146_v60  ;;  %508 = vadd.xlane.f32.xlu0 %v507_v1  ;;  %v5202_v1 = vld [vmem:[#allocation30_spill] sm:$0xff] }
 0x173   : > { %3607 = vmatpush3.bf16.msra.mxu1 %v3852_v25 }
 0x174   : > { %3608 = vmatprep.subr.bf16.mxu1 %v4130_v50 }
 0x176   : > { %512 = vadd.xlane.f32.xlu1 %v511_v18  ;;  %515 = vadd.xlane.f32.xlu0 %v514_v35  ;;  %v2446_v35 = vadd.s32 4294967289, %v2440_v62 }
 0x177   : > { %3609 = vmatpush3.bf16.msra.mxu1 %v3853_v3 }
 0x178   : > { %3610 = vmatprep.subr.bf16.mxu1 %v4130_v50 }
 0x17a   : > { %518 = vadd.xlane.f32.xlu1 %v517_v45  ;;  %521 = vadd.xlane.f32.xlu0 %v520_v48  ;;  %v2441_v45 = vadd.s32 1, %v2440_v62 }
 0x17b   : > { %3611 = vmatpush3.bf16.msra.mxu1 %v3854_v42 }
 0x17c   : > { %3612 = vmatprep.subr.bf16.mxu1 %v4130_v50  ;;  %v4812_v34 = vsub.s32 %v2441_v45, %v2443_v20 }
 0x17e   : > { %524 = vadd.xlane.f32.xlu1 %v523_v21  ;;  %527 = vadd.xlane.f32.xlu0 %v526_v23 }
 0x17f   : > { %3613 = vmatpush3.bf16.msra.mxu1 %v3855_v57 }
 0x180   : > { %3614 = vmatprep.subr.bf16.mxu1 %v4130_v50 }
 0x182   : > { %530 = vadd.xlane.f32.xlu1 %v529_v24  ;;  %533 = vadd.xlane.f32.xlu0 %v532_v59  ;;  %v4810_v59 = vsub.s32 %v2446_v35, %v2443_v20 }
 0x183   : > { %3615 = vmatpush3.bf16.msra.mxu1 %v3856_v6 }
 0x186   : > { %536 = vadd.xlane.f32.xlu1 %v535_v12  ;;  %539 = vadd.xlane.f32.xlu0 %v538_v2 }
 0x18a   : > { %542 = vadd.xlane.f32.xlu1 %v541_v32  ;;  %545 = vadd.xlane.f32.xlu0 %v544_v0 }
 0x18e   : > { %548 = vadd.xlane.f32.xlu1 %v547_v28  ;;  %551 = vadd.xlane.f32.xlu0 %v550_v37 }
 0x192   : > { %554 = vadd.xlane.f32.xlu1 %v553_v30 }
 0x1e9   : > { %v4783_v40 = vpop.xlane.xlu0 %2151 }
 0x1ed   : > { %v4785_v9 = vpop.xlane.xlu1 %2153  ;;  %v4787_v10 = vpop.xlane.xlu0 %2147 }
 0x1f1   : > { %v4789_v4 = vpop.xlane.xlu1 %2149 }
 0x1f3   : > { %v4791_v29 = vpop.xlane.xlu0 %2155 }
 0x1f4   : > { %v2163_v61 = vmax.f32 %v4787_v10, %v4791_v29 }
 0x1f7   : > { %v4793_v31 = vpop.xlane.xlu1 %2157  ;;  %v4795_v46 = vpop.xlane.xlu0 %2159 }
 0x1f8   : > { %v2164_v47 = vmax.f32 %v4789_v4, %v4793_v31  ;;  %v2165_v11 = vmax.f32 %v4783_v40, %v4795_v46 }
 0x1fa   : > { %v2167_v8 = vmax.f32 %v2163_v61, %v2164_v47 }
 0x1fb   : > { %v4799_v14 = vpop.xlane.xlu1 %2161  ;;  %v509_v7 = vpop.xlane.xlu0 %508 }
 0x1fc   : > { %v2166_v15 = vmax.f32 %v4785_v9, %v4799_v14  ;;  %v557_v60 = vadd.f32 %v5202_v1, %v509_v7 }
 0x1fe   : > { %v2168_v18 = vmax.f32 %v2165_v11, %v2166_v15  ;;  %v3352_v43 = vmul.f32 -1.442695, %v557_v60 }
 0x1ff   : > { %v513_v41 = vpop.xlane.xlu1 %512  ;;  %v516_v48 = vpop.xlane.xlu0 %515 }
 0x200   : > { %v2169_v33 = vmax.f32 %v2167_v8, %v2168_v18  ;;  %v558_v21 = vadd.f32 %v5202_v1, %v513_v41  ;;  %v559_v52 = vadd.f32 %v5202_v1, %v516_v48  ;;  %3897 = vpow2.f32 %v3352_v43 }
 0x202   : > { %v2170_v23 = vrot.slane %v2169_v33, 4  ;;  %v3353_v49 = vmul.f32 -1.442695, %v558_v21  ;;  %v2367_v24 = vpack.c.bf16 %v558_v21, %v557_v60  ;;  %v3354_v53 = vmul.f32 -1.442695, %v559_v52 }
 0x203   : > { %v519_v12 = vpop.xlane.xlu1 %518  ;;  %v522_v16 = vpop.xlane.xlu0 %521 }
 0x204   : > { %v2171_v2 = vmax.f32 %v2169_v33, %v2170_v23  ;;  %3899 = vpow2.f32 %v3353_v49  ;;  %v2423_v17 = vunpack.c.l.b16 %v2367_v24  ;;  %v2424_v32 = vunpack.c.h.b16 %v2367_v24 }
 0x205   : > { %v560_v27 = vadd.f32 %v5202_v1, %v519_v12  ;;  %3901 = vpow2.f32 %v3354_v53  ;;  %v561_v0 = vadd.f32 %v5202_v1, %v522_v16 }
 0x206   : > { %v2172_v19 = vrot.slane %v2171_v2, 2  ;;  %v2445_v50 = vrot.slane %v2423_v17, %v4812_v34  ;;  %v2450_v22 = vrot.slane %v2424_v32, %v4810_v59 }
 0x207   : > { %v3355_v28 = vmul.f32 -1.442695, %v560_v27  ;;  %v2368_v26 = vpack.c.bf16 %v560_v27, %v559_v52  ;;  %v525_v37 = vpop.xlane.xlu1 %524  ;;  %v3356_v38 = vmul.f32 -1.442695, %v561_v0  ;;  %v528_v30 = vpop.xlane.xlu0 %527 }
 0x208   : > { %v2173_v36 = vmax.f32 %v2171_v2, %v2172_v19  ;;  %v562_v39 = vadd.f32 %v5202_v1, %v525_v37  ;;  %v563_v42 = vadd.f32 %v5202_v1, %v528_v30  ;;  %v2452_v11 = vsel %vm2451_vm10, %v2450_v22, %v2445_v50 }
 0x209   : > { %3903 = vpow2.f32 %v3355_v28  ;;  %v2425_v25 = vunpack.c.l.b16 %v2368_v26  ;;  %v2426_v3 = vunpack.c.h.b16 %v2368_v26 }
 0x20a   : > { %v2174_v57 = vrot.slane %v2173_v36, 1  ;;  %v3357_v6 = vmul.f32 -1.442695, %v562_v39  ;;  %v2369_v58 = vpack.c.bf16 %v562_v39, %v561_v0  ;;  %3905 = vpow2.f32 %v3356_v38 }
 0x20b   : > { %v2456_v47 = vrot.slane %v2425_v25, %v4812_v34  ;;  %v2460_v62 = vrot.slane %v2426_v3, %v4810_v59  ;;  %v531_v7 = vpop.xlane.xlu1 %530  ;;  %v3358_v18 = vmul.f32 -1.442695, %v563_v42  ;;  %v534_v20 = vpop.xlane.xlu0 %533 }
 0x20c   : > { %v2175_v61 = vmax.f32 %v2173_v36, %v2174_v57  ;;  %3907 = vpow2.f32 %v3357_v6  ;;  %v2427_v60 = vunpack.c.l.b16 %v2369_v58  ;;  %v2428_v8 = vunpack.c.h.b16 %v2369_v58 }
 0x20d   : > { %v2461_v15 = vsel %vm2451_vm10, %v2460_v62, %v2456_v47  ;;  %v3898_v49 = vpop.eup %3897  ;;  %3909 = vpow2.f32 %v3358_v18 }
 0x20e   : > { %v2176_v35 = vsub.f32 %v4787_v10, %v2175_v61  ;;  %v2177_v41 = vsub.f32 %v4789_v4, %v2175_v61  ;;  %v2178_v45 = vsub.f32 %v4783_v40, %v2175_v61  ;;  %v2179_v43 = vsub.f32 %v4785_v9, %v2175_v61 }
 0x20f   : > { %v2180_v48 = vsub.f32 %v4791_v29, %v2175_v61  ;;  %v2181_v33 = vsub.f32 %v4793_v31, %v2175_v61  ;;  %v2182_v21 = vsub.f32 %v4795_v46, %v2175_v61  ;;  %v2183_v52 = vsub.f32 %v4799_v14, %v2175_v61  ;;  %v537_v23 = vpop.xlane.xlu1 %536  ;;  %v540_v0 = vpop.xlane.xlu0 %539 }
 0x210   : > { %v2184_v24 = vmul.f32 1.442695, %v2176_v35  ;;  %v2186_v53 = vmul.f32 1.442695, %v2177_v41  ;;  %v2188_v10 = vmul.f32 1.442695, %v2178_v45  ;;  %v564_v4 = vadd.f32 %v5202_v1, %v531_v7 }
 0x211   : > { %v3900_v12 = vpop.eup %3899  ;;  %v2190_v40 = vmul.f32 1.442695, %v2179_v43  ;;  %v2517_v9 = vsel %vm2516_vm11, %v2461_v15, %v2452_v11  ;;  %v565_v29 = vadd.f32 %v5202_v1, %v534_v20  ;;  %v2192_v31 = vmul.f32 1.442695, %v2180_v48 }
 0x212   : > { %v3902_v16 = vpop.eup %3901  ;;  %3911 = vpow2.f32 %v2184_v24  ;;  %v2194_v46 = vmul.f32 1.442695, %v2181_v33  ;;  %v2465_v14 = vrot.slane %v2427_v60, %v4812_v34  ;;  %v2196_v2 = vmul.f32 1.442695, %v2182_v21 }
 0x213   : > { %3913 = vpow2.f32 %v2186_v53  ;;  %v2198_v17 = vmul.f32 1.442695, %v2183_v52  ;;  %v2469_v32 = vrot.slane %v2428_v8, %v4810_v59  ;;  %v543_v27 = vpop.xlane.xlu1 %542  ;;  %v2855_v19 = vadd.f32 1.0, %v3900_v12  ;;  %v546_v60 = vpop.xlane.xlu0 %545 }
 0x214   : > { %3915 = vpow2.f32 %v2188_v10  ;;  %v2370_v28 = vpack.c.bf16 %v564_v4, %v563_v42  ;;  %v566_v26 = vadd.f32 %v5202_v1, %v537_v23  ;;  %v2854_v37 = vadd.f32 1.0, %v3898_v49 }
 0x215   : > { %3917 = vpow2.f32 %v2190_v40  ;;  %v2856_v38 = vadd.f32 1.0, %v3902_v16  ;;  %v3359_v30 = vmul.f32 -1.442695, %v564_v4  ;;  %v2470_v50 = vsel %vm2451_vm10, %v2469_v32, %v2465_v14 }
 0x216   : > { %v3904_v36 = vpop.eup %3903  ;;  %3919 = vpow2.f32 %v2192_v31  ;;  %v2429_v22 = vunpack.c.l.b16 %v2370_v28  ;;  %v2430_v39 = vunpack.c.h.b16 %v2370_v28  ;;  %v2371_v25 = vpack.c.bf16 %v566_v26, %v565_v29 }
 0x217   : > { %3921 = vpow2.f32 %v2194_v46  ;;  %v3360_v3 = vmul.f32 -1.442695, %v565_v29  ;;  %v568_v57 = vadd.f32 %v5202_v1, %v543_v27  ;;  %v549_v6 = vpop.xlane.xlu1 %548  ;;  %v3906_v42 = vpop.eup %3905  ;;  %v2857_v58 = vadd.f32 1.0, %v3904_v36 }
 0x218   : > { %3923 = vpow2.f32 %v2196_v2  ;;  %v2474_v47 = vrot.slane %v2429_v22, %v4812_v34  ;;  %v2478_v62 = vrot.slane %v2430_v39, %v4810_v59  ;;  %v2519_v61 = vsel %vm2518_vm12, %v2470_v50, %v2517_v9  ;;  %v552_v16 = vpop.xlane.xlu0 %551 }
 0x219   : > { %v3908_v7 = vpop.eup %3907  ;;  %3925 = vpow2.f32 %v2198_v17  ;;  %v2431_v11 = vunpack.c.l.b16 %v2371_v25  ;;  %v2432_v15 = vunpack.c.h.b16 %v2371_v25  ;;  %v567_v20 = vadd.f32 %v5202_v1, %v540_v0 }
 0x21a   : > { %3927 = vrcp.f32 %v2855_v19  ;;  %v2859_v8 = vadd.f32 1.0, %v3908_v7  ;;  %v2479_v18 = vsel %vm2451_vm10, %v2478_v62, %v2474_v47  ;;  %v2858_v35 = vadd.f32 1.0, %v3906_v42  ;;  %v3910_v24 = vpop.eup %3909 }
 0x21b   : > { %3929 = vrcp.f32 %v2854_v37  ;;  %v3361_v41 = vmul.f32 -1.442695, %v566_v26  ;;  %v2483_v45 = vrot.slane %v2431_v11, %v4812_v34  ;;  %v2487_v43 = vrot.slane %v2432_v15, %v4810_v59  ;;  %v555_v21 = vpop.xlane.xlu1 %554 }
 0x21c   : > { %3931 = vrcp.f32 %v2857_v58  ;;  %v3363_v48 = vmul.f32 -1.442695, %v568_v57  ;;  %v2372_v33 = vpack.c.bf16 %v568_v57, %v567_v20  ;;  %v2521_v52 = vsel %vm2520_vm13, %v2479_v18, %v2519_v61 }
 0x21d   : > { %3933 = vrcp.f32 %v2856_v38  ;;  %v570_v23 = vadd.f32 %v5202_v1, %v549_v6  ;;  %v569_v49 = vadd.f32 %v5202_v1, %v546_v60  ;;  %v2488_v53 = vsel %vm2451_vm10, %v2487_v43, %v2483_v45 }
 0x21e   : > { %3935 = vrcp.f32 %v2859_v8  ;;  %v2433_v10 = vunpack.c.l.b16 %v2372_v33  ;;  %v2434_v4 = vunpack.c.h.b16 %v2372_v33  ;;  %v3362_v40 = vmul.f32 -1.442695, %v567_v20 }
 0x21f   : > { %v4851_v12 = vpop.eup %3911  ;;  %3937 = vrcp.f32 %v2858_v35  ;;  %v2373_v9 = vpack.c.bf16 %v570_v23, %v569_v49  ;;  %v572_v29 = vadd.f32 %v5202_v1, %v555_v21  ;;  %v2523_v46 = vsel %vm2522_vm14, %v2488_v53, %v2521_v52 }
 0x220   : > { %v4854_v31 = vpop.eup %3913  ;;  %3939 = vpow2.f32 %v3359_v30  ;;  %v2492_v14 = vrot.slane %v2433_v10, %v4812_v34  ;;  %v2496_v2 = vrot.slane %v2434_v4, %v4810_v59  ;;  %v3365_v27 = vmul.f32 -1.442695, %v570_v23 }
 0x221   : > { %v4859_v17 = vpop.eup %3915  ;;  %v2200_v32 = vadd.f32 %v4854_v31, %v4851_v12  ;;  %v2435_v0 = vunpack.c.l.b16 %v2373_v9  ;;  %v2436_v19 = vunpack.c.h.b16 %v2373_v9  ;;  %3941 = vpow2.f32 %v3361_v41 }
 0x222   : > { %v4863_v28 = vpop.eup %3917  ;;  %v2497_v26 = vsel %vm2451_vm10, %v2496_v2, %v2492_v14  ;;  %v3364_v37 = vmul.f32 -1.442695, %v569_v49  ;;  %v571_v38 = vadd.f32 %v5202_v1, %v552_v16  ;;  %3943 = vpow2.f32 %v3360_v3 }
 0x223   : > { %v4867_v30 = vpop.eup %3919  ;;  %v2201_v36 = vadd.f32 %v4859_v17, %v2200_v32  ;;  %v2501_v50 = vrot.slane %v2435_v0, %v4812_v34  ;;  %v2505_v22 = vrot.slane %v2436_v19, %v4810_v59  ;;  %3945 = vpow2.f32 %v3363_v48 }
 0x224   : > { %v4872_v39 = vpop.eup %3921  ;;  %v3367_v25 = vmul.f32 -1.442695, %v572_v29  ;;  %v2374_v57 = vpack.c.bf16 %v572_v29, %v571_v38  ;;  %v3366_v6 = vmul.f32 -1.442695, %v571_v38  ;;  %3947 = vpow2.f32 %v3362_v40 }
 0x225   : > { %v4874_v42 = vpop.eup %3923  ;;  %v2202_v58 = vadd.f32 %v4863_v28, %v2201_v36  ;;  %v2506_v1 = vsel %vm2451_vm10, %v2505_v22, %v2501_v50  ;;  %v2525_v47 = vsel %vm2524_vm15, %v2497_v26, %v2523_v46  ;;  %3949 = vpow2.f32 %v3365_v27 }
 0x226   : > { %v4879_v3 = vpop.eup %3925  ;;  %v2437_v62 = vunpack.c.l.b16 %v2374_v57  ;;  %v2438_v7 = vunpack.c.h.b16 %v2374_v57  ;;  %v2860_v15 = vadd.f32 1.0, %v3910_v24  ;;  %3951 = vpow2.f32 %v3364_v37 }
 0x227   : > { %v3928_v61 = vpop.eup %3927  ;;  %v2203_v11 = vadd.f32 %v4867_v30, %v2202_v58  ;;  %3953 = vpow2.f32 %v3367_v25  ;;  %v2527_v20 = vsel %vm2526_vm0, %v2506_v1, %v2525_v47 }
 0x228   : > { %v3930_v60 = vpop.eup %3929  ;;  %v2510_v8 = vrot.slane %v2437_v62, %v4812_v34  ;;  %v2514_v18 = vrot.slane %v2438_v7, %v4810_v59  ;;  %3955 = vpow2.f32 %v3366_v6  ;;  %v2925_v2 = vrot.slane %v3928_v61, %v4810_v59 }
 0x229   : > { %v3932_v35 = vpop.eup %3931  ;;  %v2204_v41 = vadd.f32 %v4872_v39, %v2203_v11  ;;  %3957 = vrcp.f32 %v2860_v15  ;;  %v2921_v19 = vrot.slane %v3930_v60, %v4812_v34 }
 0x22a   : > { %v3934_v45 = vpop.eup %3933  ;;  %v2515_v43 = vsel %vm2451_vm10, %v2514_v18, %v2510_v8  ;;  %v2934_v38 = vrot.slane %v3932_v35, %v4810_v59 }
 0x22b   : > { %v3936_v48 = vpop.eup %3935  ;;  %v2205_v33 = vadd.f32 %v4874_v42, %v2204_v41  ;;  %v2529_v21 = vsel %vm2528_vm1, %v2515_v43, %v2527_v20  ;;  %v2930_v36 = vrot.slane %v3934_v45, %v4812_v34  ;;  %v2926_v61 = vsel %vm2451_vm10, %v2925_v2, %v2921_v19 }
 0x22c   : > { %v3938_v52 = vpop.eup %3937  ;;  %v4889_v23 = vpack.c.b16 %v2529_v21, %v2529_v21  ;;  %v2943_v58 = vrot.slane %v3936_v48, %v4810_v59 }
 0x22d   : > { %v3940_v49 = vpop.eup %3939  ;;  %v2206_v24 = vadd.f32 %v4879_v3, %v2205_v33  ;;  %v2939_v62 = vrot.slane %v3938_v52, %v4812_v34  ;;  %v2935_v11 = vsel %vm2451_vm10, %v2934_v38, %v2930_v36 }
 0x22e   : > { %v2861_v53 = vadd.f32 1.0, %v3940_v49  ;;  %3656 = vmatprep.subr.msk.bf16.mxu1 %vm2556_vm2, %v4889_v23  ;;  %v3942_v10 = vpop.eup %3941  ;;  %v2990_v8 = vsel %vm2518_vm12, %v2935_v11, %v2926_v61 }
 0x22f   : > { %v2207_v4 = vrot.slane %v2206_v24, 4  ;;  %v3944_v40 = vpop.eup %3943  ;;  %v2863_v9 = vadd.f32 1.0, %v3942_v10  ;;  %v2944_v18 = vsel %vm2451_vm10, %v2943_v58, %v2939_v62 }
 0x230   : > { %3959 = vrcp.f32 %v2861_v53  ;;  %v3946_v29 = vpop.eup %3945  ;;  %v2862_v46 = vadd.f32 1.0, %v3944_v40  ;;  %v2991_v45 = vsel %vm2520_vm13, %v2944_v18, %v2990_v8 }
 0x231   : > { %v2208_v16 = vadd.f32 %v2207_v4, %v2206_v24  ;;  %v3948_v14 = vpop.eup %3947  ;;  %3961 = vrcp.f32 %v2863_v9  ;;  %v2865_v32 = vadd.f32 1.0, %v3946_v29 }
 0x232   : > { %v3950_v27 = vpop.eup %3949  ;;  %3963 = vrcp.f32 %v2862_v46  ;;  %v2864_v26 = vadd.f32 1.0, %v3948_v14 }
 0x233   : > { %v2209_v0 = vrot.slane %v2208_v16, 2  ;;  %v3952_v37 = vpop.eup %3951  ;;  %3965 = vrcp.f32 %v2865_v32  ;;  %v2867_v50 = vadd.f32 1.0, %v3950_v27 }
 0x234   : > { %v3954_v22 = vpop.eup %3953  ;;  %3967 = vrcp.f32 %v2864_v26  ;;  %v2866_v57 = vadd.f32 1.0, %v3952_v37 }
 0x235   : > { %v2210_v25 = vadd.f32 %v2209_v0, %v2208_v16  ;;  %v3956_v6 = vpop.eup %3955  ;;  %3969 = vrcp.f32 %v2867_v50  ;;  %v2869_v1 = vadd.f32 1.0, %v3954_v22 }
 0x236   : > { %3971 = vrcp.f32 %v2866_v57  ;;  %v2868_v7 = vadd.f32 1.0, %v3956_v6  ;;  %v3958_v15 = vpop.eup %3957 }
 0x237   : > { %v2211_v47 = vrot.slane %v2210_v25, 1  ;;  %3973 = vrcp.f32 %v2869_v1  ;;  %v2948_v20 = vrot.slane %v3958_v15, %v4812_v34 }
 0x238   : > { %3975 = vrcp.f32 %v2868_v7 }
 0x239   : > { %v2212_v60 = vadd.f32 %v2211_v47, %v2210_v25 }
 0x23b   : > { %3977 = vrcp.f32 %v2212_v60 }
 0x23d   : > { %v3960_v35 = vpop.eup %3959 }
 0x23e   : > { %v2952_v41 = vrot.slane %v3960_v35, %v4810_v59  ;;  %v3962_v43 = vpop.eup %3961  ;;  %v3860_v35 = vld [vmem:[%s5129_s8 + $0x18] sm:$0xff]  }
 0x23f   : > { %v3964_v48 = vpop.eup %3963  ;;  %v2961_v33 = vrot.slane %v3962_v43, %v4810_v59  ;;  %v3864_v43 = vld [vmem:[%s5129_s8 + $0x38] sm:$0xff]  }
 0x240   : > { %v2953_v21 = vsel %vm2451_vm10, %v2952_v41, %v2948_v20  ;;  %v3966_v52 = vpop.eup %3965  ;;  %v2957_v24 = vrot.slane %v3964_v48, %v4812_v34  ;;  %v3862_v41 = vld [vmem:[%s5129_s8 + $0x28] sm:$0xff]   ;;  %v2665_v48 = vld [vmem:[%s5130_s9] sm:$0xf] }
 0x241   : > { %v2992_v49 = vsel %vm2522_vm14, %v2953_v21, %v2991_v45  ;;  %v3968_v53 = vpop.eup %3967  ;;  %v2970_v10 = vrot.slane %v3966_v52, %v4810_v59  ;;  %v3863_v45 = vld [vmem:[%s5129_s8 + $0x30] sm:$0xff]   ;;  %3657 = vmatprep.subr.msk.bf16.mxu0 %vm2556_vm2, %v2665_v48  ;;  %v2260_v21 = vld [vmem:[%s5128_s7] sm:$0x1] }
 0x242   : > { %v3970_v4 = vpop.eup %3969  ;;  %v2966_v40 = vrot.slane %v3968_v53, %v4812_v34  ;;  %v2962_v9 = vsel %vm2451_vm10, %v2961_v33, %v2957_v24  ;;  %v2691_v33 = vsel %vm2556_vm2, %v2665_v48, 0 }
 0x243   : > { %v3972_v29 = vpop.eup %3971  ;;  %v2979_v16 = vrot.slane %v3970_v4, %v4810_v59  ;;  %v2993_v46 = vsel %vm2524_vm15, %v2962_v9, %v2992_v49  ;;  %3639 = vmatpush3.bf16.msra.mxu0 %v2691_v33 }
 0x244   : > { %v3974_v14 = vpop.eup %3973  ;;  %v2971_v2 = vsel %vm2451_vm10, %v2970_v10, %v2966_v40  ;;  %v2975_v32 = vrot.slane %v3972_v29, %v4812_v34 }
 0x245   : > { %v3976_v27 = vpop.eup %3975  ;;  %v2994_v0 = vsel %vm2526_vm0, %v2971_v2, %v2993_v46  ;;  %v2988_v38 = vrot.slane %v3974_v14, %v4810_v59 }
 0x246   : > { %v2980_v19 = vsel %vm2451_vm10, %v2979_v16, %v2975_v32  ;;  %v2984_v25 = vrot.slane %v3976_v27, %v4812_v34 }
 0x247   : > { %v2995_v37 = vsel %vm2528_vm1, %v2980_v19, %v2994_v0 }
 0x248   : > { %v3978_v26 = vpop.eup %3977  ;;  %2999 = vst.msk [vmem:[%s4930_s18 - $0x1] sm:$0xfe] %vm2998_vm3, %v2995_v37 }
 0x249   : > { %v2214_v36 = vmul.f32 %v3978_v26, %v4851_v12  ;;  %v2215_v50 = vmul.f32 %v3978_v26, %v4854_v31  ;;  %v2216_v22 = vmul.f32 %v3978_v26, %v4859_v17  ;;  %v2217_v57 = vmul.f32 %v3978_v26, %v4863_v28 }
 0x24a   : > { %v2218_v59 = vmul.f32 %v3978_v26, %v4867_v30  ;;  %v2989_v17 = vsel %vm2451_vm10, %v2988_v38, %v2984_v25  ;;  %v2219_v34 = vmul.f32 %v3978_v26, %v4872_v39  ;;  %v2220_v28 = vmul.f32 %v3978_v26, %v4874_v42 }
 0x24b   : > { %v2222_v6 = vmul.f32 %v2214_v36, %v4703_v55  ;;  %v2223_v58 = vmul.f32 %v2215_v50, %v4710_v54  ;;  %v2224_v12 = vmul.f32 %v2216_v22, %v4699_v51  ;;  %3001 = vst.msk [vmem:[%s4930_s18 + $0x7] sm:$0x1] %vm3000_vm4, %v2989_v17  ;;  %v2225_v1 = vmul.f32 %v2217_v57, %v4708_v44 }
 0x24c   : > { %v2226_v55 = vmul.f32 %v2218_v59, %v4714_v13  ;;  %v2221_v54 = vmul.f32 %v3978_v26, %v4879_v3  ;;  %v2227_v30 = vmul.f32 %v2219_v34, %v4720_v63  ;;  %v2228_v51 = vmul.f32 %v2220_v28, %v4717_v56  ;;  %v3857_v13 = vld [vmem:[%s5129_s8] sm:$0xff]   ;;  %v3858_v63 = vld [vmem:[%s5129_s8 + $0x8] sm:$0xff]  }
 0x24d   : > { %v2230_v31 = vadd.f32 %v2223_v58, %v2222_v6  ;;  %v2558_v56 = vsel %vm2556_vm2, %v4889_v23, 0  ;;  %v3861_v23 = vld [vmem:[%s5129_s8 + $0x20] sm:$0xff]  }
 0x24e   : > { %v2229_v11 = vmul.f32 %v2221_v54, %v4722_v5  ;;  %v3859_v5 = vld [vmem:[%s5129_s8 + $0x10] sm:$0xff]  }
 0x24f   : > { %v2231_v47 = vadd.f32 %v2230_v31, %v2224_v12 }
 0x251   : > { %v2232_v62 = vadd.f32 %v2231_v47, %v2225_v1 }
 0x253   : > { %v2233_v7 = vadd.f32 %v2232_v62, %v2226_v55 }
 0x255   : > { %v2234_v61 = vadd.f32 %v2233_v7, %v2227_v30 }
 0x257   : > { %v2235_v15 = vadd.f32 %v2234_v61, %v2228_v51 }
 0x259   : > { %v2236_v39 = vadd.f32 %v2235_v15, %v2229_v11 }
 0x25b   : > { %v2237_v60 = vrot.slane %v2236_v39, 4 }
 0x25d   : > { %v2238_v44 = vadd.f32 %v2237_v60, %v2236_v39 }
 0x25f   : > { %v2239_v8 = vrot.slane %v2238_v44, 2 }
 0x261   : > { %v2240_v18 = vadd.f32 %v2239_v8, %v2238_v44 }
 0x263   : > { %v2241_v42 = vrot.slane %v2240_v18, 1 }
 0x265   : > { %v2242_v20 = vadd.f32 %v2241_v42, %v2240_v18 }
 0x267   : > { %v2243_v3 = vpack.c.bf16 %v2242_v20, %v2242_v20 }
 0x269   : > { %3617 = vmatmul.mubr.bf16.vlgmr.msra.gmra.mxu1 %v2243_v3 }
 0x26a   : > { %3621 = vmatpush3.bf16.msra.mxu1 %v2558_v56  ;;  %3622 = vmatprep.mubr.msk.bf16.mxu1 %vm2531_vm5, %v3857_v13 }
 0x271   : > { %3623 = vmatmul.mubr.msk.bf16.vlgmr.msra.gmra.mxu1 %vm2531_vm5, %v3858_v63 }
 0x272   : > { %3626 = vmatprep.mubr.msk.bf16.mxu1 %vm2531_vm5, %v3859_v5 }
 0x279   : > { %3627 = vmatmul.mubr.msk.bf16.gmra.mxu1 %vm2531_vm5, %v3860_v35 }
 0x27a   : > { %3630 = vmatprep.mubr.msk.bf16.mxu1 %vm2531_vm5, %v3861_v23 }
 0x281   : > { %3631 = vmatmul.mubr.msk.bf16.gmra.mxu1 %vm2531_vm5, %v3862_v41 }
 0x282   : > { %3634 = vmatprep.mubr.msk.bf16.mxu1 %vm2531_vm5, %v3863_v45 }
 0x289   : > { %3635 = vmatmul.mubr.msk.bf16.gmra.mxu1 %vm2531_vm5, %v3864_v43 }
 0x329   : > { %v2343_v52 = vpop.f32.mrf.mxu1 }
 0x32a   : > { %v2344_v49 = vadd.f32 %v2343_v52, %v2260_v21 }
 0x32b   : > { %v3618_v24 = vpop.f32.mrf.mxu1 }
 0x32c   : > { %2350 = vst.msk [vmem:[%s5153_s29] sm:$0x1] %vm2349_vm6, %v2344_v49  ;;  %s4132_s29 = smov [#allocation7]  }
 0x32d   : > { %v2346_v53 = vpop.f32.mrf.mxu1  ;;  %s4009_s0 = sshll.u32 %s4132_s29, 4  ;;  %s4010_s0 = int_to_ptr.vmem [resolvable:$false] %s4009_s0 }
 0x32e   : > { %s4011_s1 = scalar_lea.vmem %s4010_s0, 256  ;;  %p4012_p11 = scmp.lt.s32.totalorder %s3026_s20, %s4010_s0 }
 0x32f   : > { %v3619_v10 = vpop.f32.mrf.mxu1  ;;  %p4013_p12 = scmp.lt.s32.totalorder %s4011_s1, %s4005_s22 }
 0x331   : > { %v3624_v4 = vpop.f32.mrf.mxu1  ;;  %p4014_p13 = por %p4013_p12, %p4012_p11 }
 0x333   : > { %v2594_v40 = vpop.f32.mrf.mxu1  ;;  %p4015_p0 = pnand %p4014_p13, %p4008_p10 }
 0x335   : > { %v3625_v9 = vpop.f32.mrf.mxu1 }
 0x336   : > { %v2658_v46 = vpack.c.bf16 %v3625_v9, %v3624_v4 }
 0x337   : > { %v2597_v29 = vpop.f32.mrf.mxu1 }
 0x338   : > { %v2657_v16 = vpack.c.bf16 %v2597_v29, %v2594_v40 }
 0x339   : > { %v3628_v14 = vpop.f32.mrf.mxu1 }
 0x33a   : > { %3640 = vmatprep.mubr.msk.bf16.mxu0 %vm2531_vm5, %v2657_v16 }
 0x33b   : > { %v2610_v2 = vpop.f32.mrf.mxu1  ;;  %3641 = vmatmul.mubr.msk.bf16.vlgmr.msra.gmra.mxu0 %vm2531_vm5, %v2658_v46 }
 0x33d   : > { %v3629_v32 = vpop.f32.mrf.mxu1 }
 0x33e   : > { %v2660_v19 = vpack.c.bf16 %v3629_v32, %v3628_v14 }
 0x33f   : > { %v2613_v27 = vpop.f32.mrf.mxu1 }
 0x340   : > { %v2659_v0 = vpack.c.bf16 %v2613_v27, %v2610_v2 }
 0x341   : > { %v3632_v26 = vpop.f32.mrf.mxu1 }
 0x342   : > { %3644 = vmatprep.mubr.msk.bf16.mxu0 %vm2531_vm5, %v2659_v0 }
 0x343   : > { %v2626_v37 = vpop.f32.mrf.mxu1  ;;  %3645 = vmatmul.mubr.msk.bf16.gmra.mxu0 %vm2531_vm5, %v2660_v19 }
 0x345   : > { %v3633_v38 = vpop.f32.mrf.mxu1 }
 0x346   : > { %v2662_v22 = vpack.c.bf16 %v3633_v38, %v3632_v26 }
 0x347   : > { %v2629_v36 = vpop.f32.mrf.mxu1 }
 0x348   : > { %v2661_v50 = vpack.c.bf16 %v2629_v36, %v2626_v37 }
 0x349   : > { %v3636_v25 = vpop.f32.mrf.mxu1 }
 0x34a   : > { %3648 = vmatprep.mubr.msk.bf16.mxu0 %vm2531_vm5, %v2661_v50 }
 0x34b   : > { %v2642_v57 = vpop.f32.mrf.mxu1  ;;  %3649 = vmatmul.mubr.msk.bf16.gmra.mxu0 %vm2531_vm5, %v2662_v22 }
 0x34d   : > { %v3637_v6 = vpop.f32.mrf.mxu1 }
 0x34e   : > { %v2664_v12 = vpack.c.bf16 %v3637_v6, %v3636_v25 }
 0x34f   : > { %v2645_v58 = vpop.f32.mrf.mxu1 }
 0x350   : > { %v2663_v59 = vpack.c.bf16 %v2645_v58, %v2642_v57 }
 0x352   : > { %3652 = vmatprep.mubr.msk.bf16.mxu0 %vm2531_vm5, %v2663_v59 }
 0x353   : > { %3653 = vmatmul.mubr.msk.bf16.gmra.mxu0 %vm2531_vm5, %v2664_v12 }
 0x354   : > { %4018 = shalt.err (!%p4015_p0)
}
 0x355   : > { %s4019_s3 = scalar_lea.hbm %s3023_s19, 128  ;;  %s4023_s27 = scalar_lea.hbm %s5131_s10, 256 }
 0x356   : > { %p4020_p1 = scmp.ne.s32.totalorder %s3023_s19, %s4019_s3  ;;  %p4024_p4 = scmp.lt.s32.totalorder %s3023_s19, %s5131_s10 }
 0x357   : > { %p4025_p7 = scmp.lt.s32.totalorder %s4023_s27, %s4019_s3 }
 0x358   : > { %p4021_p2 = pnand %p4020_p1, %p4245_p5 }
 0x359   : > { %p4026_p6 = por %p4025_p7, %p4024_p4 }
 0x35a   : > { %p4022_p3 = pneg %p4021_p2 }
 0x35c   : > { %p4027_p8 = pnand %p4026_p6, %p4022_p3 }
 0x35e   : > { %4030 = shalt.err (!%p4027_p8)
}
 0x35f   : > { %3663 = dma.vmem_to_hbm [thread:$0]  (%p4245_p5), %s3026_s20, 128, %s3023_s19, %s3003_s21  }
 0x360   : > { %s3189_s0 = sshll.u32 %s4910_s16, 7  ;;  %s3007_s3 = sand.u32 1, %s4226_s2  }
 0x361   : > { %s5020_s1 = scalar_lea.vmem [#allocation8], %s3189_s0  ;;  %s3376_s4 = sshll.u32 %s4226_s2, 11 }
 0x362   : > { %s3038_s29 = sshll.u32 %s5020_s1, 4  ;;  %s3373_s19 = sshll.u32 %s4226_s2, 4  ;;  %s5048_s29 = int_to_ptr.vmem [resolvable:$true] %s3038_s29 }
 0x363   : > { %s5203_s20 = scalar_lea.vmem [#allocation10], %s4910_s16  ;;  %s5045_s30 = scalar_lea.hbm %s5132_s11, %s3376_s4 }
 0x364   : > { %s3054_s21 = sshll.u32 %s5203_s20, 4  ;;  %s5053_s0 = scalar_lea.hbm %s5133_s12, %s3373_s19  ;;  %s5055_s21 = int_to_ptr.vmem [resolvable:$true] %s3054_s21 }
 0x365   : > { %s5058_s2 = scalar_lea.sflag [#allocation9], %s3007_s3  ;;  %s4031_s16 = scalar_lea.vmem %s5048_s29, 2048 }
 0x366   : > { %p4032_p9 = scmp.ne.s32.totalorder %s5048_s29, %s4031_s16  ;;  %s4133_s4 = smov [#allocation8]  }
 0x367   : > { %s4035_s20 = sshll.u32 %s4133_s4, 4  ;;  %s4036_s20 = int_to_ptr.vmem [resolvable:$false] %s4035_s20 }
 0x368   : > { %p4033_p10 = pnand %p4032_p9, %p4245_p5  ;;  %s4037_s22 = scalar_lea.vmem %s4036_s20, 4096 }
 0x369   : > { %p4038_p12 = scmp.lt.s32.totalorder %s5048_s29, %s4036_s20  ;;  %p4039_p13 = scmp.lt.s32.totalorder %s4037_s22, %s4031_s16 }
 0x36a   : > { %p4034_p11 = pneg %p4033_p10 }
 0x36b   : > { %p4040_p0 = por %p4039_p13, %p4038_p12 }
 0x36d   : > { %p4041_p1 = pnand %p4040_p0, %p4034_p11 }
 0x3fb   : > { %v3642_v31 = vpop.f32.mrf.mxu0 }
 0x3fc   : > { %2792 = vst [vmem:[%s5020_s1 + $0x10] sm:$0xff] %v3642_v31 }
 0x3fd   : > { %v2727_v17 = vpop.f32.mrf.mxu0 }
 0x3fe   : > { %2790 = vst [vmem:[%s5020_s1] sm:$0xff] %v2727_v17 }
 0x3ff   : > { %v3643_v34 = vpop.f32.mrf.mxu0 }
 0x400   : > { %2793 = vst [vmem:[%s5020_s1 + $0x18] sm:$0xff] %v3643_v34 }
 0x401   : > { %v2730_v1 = vpop.f32.mrf.mxu0 }
 0x402   : > { %2791 = vst [vmem:[%s5020_s1 + $0x8] sm:$0xff] %v2730_v1 }
 0x403   : > { %v3646_v47 = vpop.f32.mrf.mxu0 }
 0x404   : > { %2796 = vst [vmem:[%s5020_s1 + $0x30] sm:$0xff] %v3646_v47 }
 0x405   : > { %v2743_v28 = vpop.f32.mrf.mxu0 }
 0x406   : > { %2794 = vst [vmem:[%s5020_s1 + $0x20] sm:$0xff] %v2743_v28 }
 0x407   : > { %v3647_v55 = vpop.f32.mrf.mxu0 }
 0x408   : > { %2797 = vst [vmem:[%s5020_s1 + $0x38] sm:$0xff] %v3647_v55 }
 0x409   : > { %v2746_v62 = vpop.f32.mrf.mxu0 }
 0x40a   : > { %2795 = vst [vmem:[%s5020_s1 + $0x28] sm:$0xff] %v2746_v62 }
 0x40b   : > { %v3650_v54 = vpop.f32.mrf.mxu0 }
 0x40c   : > { %2800 = vst [vmem:[%s5020_s1 + $0x50] sm:$0xff] %v3650_v54 }
 0x40d   : > { %v2759_v30 = vpop.f32.mrf.mxu0 }
 0x40e   : > { %2798 = vst [vmem:[%s5020_s1 + $0x40] sm:$0xff] %v2759_v30 }
 0x40f   : > { %v3651_v7 = vpop.f32.mrf.mxu0 }
 0x410   : > { %2801 = vst [vmem:[%s5020_s1 + $0x58] sm:$0xff] %v3651_v7 }
 0x411   : > { %v2762_v51 = vpop.f32.mrf.mxu0 }
 0x412   : > { %2799 = vst [vmem:[%s5020_s1 + $0x48] sm:$0xff] %v2762_v51 }
 0x413   : > { %v3654_v61 = vpop.f32.mrf.mxu0 }
 0x414   : > { %2804 = vst [vmem:[%s5020_s1 + $0x70] sm:$0xff] %v3654_v61 }
 0x415   : > { %v2775_v11 = vpop.f32.mrf.mxu0 }
 0x416   : > { %2802 = vst [vmem:[%s5020_s1 + $0x60] sm:$0xff] %v2775_v11 }
 0x417   : > { %v3655_v15 = vpop.f32.mrf.mxu0 }
 0x418   : > { %2805 = vst [vmem:[%s5020_s1 + $0x78] sm:$0xff] %v3655_v15 }
 0x419   : > { %v2778_v39 = vpop.f32.mrf.mxu0 }
 0x41a   : > { %2803 = vst [vmem:[%s5020_s1 + $0x68] sm:$0xff] %v2778_v39 }
 0x41b   : > { %4044 = shalt.err (!%p4041_p1)
}
 0x41c   : > { %s4045_s1 = scalar_lea.hbm %s5045_s30, 2048  ;;  %s4049_s18 = scalar_lea.hbm %s5132_s11, 4096 }
 0x41d   : > { %p4046_p2 = scmp.ne.s32.totalorder %s5045_s30, %s4045_s1  ;;  %p4050_p7 = scmp.lt.s32.totalorder %s5045_s30, %s5132_s11 }
 0x41e   : > { %p4051_p6 = scmp.lt.s32.totalorder %s4049_s18, %s4045_s1 }
 0x41f   : > { %p4047_p3 = pnand %p4046_p2, %p4245_p5 }
 0x420   : > { %p4052_p8 = por %p4051_p6, %p4050_p7 }
 0x421   : > { %p4048_p4 = pneg %p4047_p3 }
 0x423   : > { %p4053_p9 = pnand %p4052_p8, %p4048_p4 }
 0x425   : > { %4056 = shalt.err (!%p4053_p9)
}
 0x426   : > { %s4134_s16 = smov 128   ;;  %s4135_s4 = smov 8  }
 0x427   : > { %3664 = dma.vmem_to_hbm [thread:$0]  (%p4245_p5), %s5048_s29, 2048, %s5045_s30, %s5058_s2, %s4134_s16, %s4134_s16, %s4135_s4  }
 0x428   : > { %s4057_s20 = scalar_lea.vmem %s5055_s21, 16  ;;  %s4136_s22 = smov [#allocation10]  }
 0x429   : > { %p4058_p10 = scmp.ne.s32.totalorder %s5055_s21, %s4057_s20  ;;  %s4061_s1 = sshll.u32 %s4136_s22, 4  ;;  %s4062_s1 = int_to_ptr.vmem [resolvable:$false] %s4061_s1 }
 0x42a   : > { %s4063_s3 = scalar_lea.vmem %s4062_s1, 32  ;;  %p4064_p13 = scmp.lt.s32.totalorder %s5055_s21, %s4062_s1 }
 0x42b   : > { %p4059_p11 = pnand %p4058_p10, %p4245_p5  ;;  %p4065_p0 = scmp.lt.s32.totalorder %s4063_s3, %s4057_s20 }
 0x42d   : > { %p4060_p12 = pneg %p4059_p11  ;;  %p4066_p1 = por %p4065_p0, %p4064_p13 }
 0x42f   : > { %p4067_p2 = pnand %p4066_p1, %p4060_p12 }
 0x431   : > { %4070 = shalt.err (!%p4067_p2)
}
 0x432   : > { %s4071_s19 = scalar_lea.hbm %s5053_s0, 16  ;;  %s4075_s18 = scalar_lea.hbm %s5133_s12, 32 }
 0x433   : > { %p4072_p3 = scmp.ne.s32.totalorder %s5053_s0, %s4071_s19  ;;  %p4076_p6 = scmp.lt.s32.totalorder %s5053_s0, %s5133_s12 }
 0x434   : > { %p4077_p8 = scmp.lt.s32.totalorder %s4075_s18, %s4071_s19 }
 0x435   : > { %p4073_p4 = pnand %p4072_p3, %p4245_p5 }
 0x436   : > { %p4078_p9 = por %p4077_p8, %p4076_p6 }
 0x437   : > { %p4074_p7 = pneg %p4073_p4 }
 0x439   : > { %p4079_p10 = pnand %p4078_p9, %p4074_p7 }
 0x43b   : > { %4082 = shalt.err (!%p4079_p10)
}
 0x43c   : > { %3665 = dma.vmem_to_hbm [thread:$0]  (%p4245_p5), %s5055_s21, 16, %s5053_s0, %s5058_s2  }
 0x43d PF: > { %p3685_p11 = scmp.ge.s32.totalorder %s4125_s26, 2  ;;  %s3066_s16 = sand.u32 1, %s4113_s23  }
 0x43e   : > { %p5204_p12 = scmp.ne.s32.totalorder %s5159_s15, 0  ;;  %s3067_s4 = scalar_lea.sflag [#allocation6], %s3066_s16 }
 0x440   : > { %p3674_p13 = pnand %p3685_p11, %p5204_p12 }
 0x442   : > { %p3675_p0 = pneg %p3674_p13 }
 0x444   : > { %4104 = dma.done.wait (%p3675_p0), %s3067_s4, 128  }
 0x445   : > { %4106 = vsyncadd (%p3675_p0), %s3067_s4, 4294967168  ;;  %s5205_s20 = sadd.s32 4294967294, %s4125_s26  }
 0x446   : > { %s3075_s22 = sand.u32 1, %s5205_s20  }
 0x447   : > { %s3076_s14 = scalar_lea.sflag [#allocation9], %s3075_s22 }
 0x448   : > { %4108 = dma.done.wait (%p3675_p0), %s3076_s14, 2064  }
 0x449   : > { %4110 = vsyncadd (%p3675_p0), %s3076_s14, 4294965232  ;;  %p28_p5 = scmp.ge.s32.totalorder %s4230_s28, 4   ;;  %s5206_s23 = smov %s4117_s24 }
 0x44a   : > { %s5207_s24 = smov %s4121_s25  ;;  %s5208_s25 = smov %s4243_s13 }
 0x44b   : > { %s5209_s26 = smov %s4230_s28  ;;  %30 = sbr.rel (!%p28_p5) target bundleno = 12 (0xc), region = 132 }
 0x450   :  { %3089 = vsyncpa [#allocation5], 1 }
 0x451   :  { %3091 = vsyncpa [#allocation5 + $0x1], 1 }
 0x452   :  { %3092 = vsyncpa [#allocation6], 1 }
 0x453   :  { %3094 = vsyncpa [#allocation6 + $0x1], 1 }
 0x454   :  { %3095 = vsyncpa [#allocation9], 1 }
 0x455   :  { %3097 = vsyncpa [#allocation9 + $0x1], 1 }

</bundles_post_ra>
